<compile_context>
chip_gen: v6e
topology: v6e:2x2x1
jax: 0.10.0
libtpu: 0.0.40
codegen_flags: <defaults>
</compile_context>

<pallas_src>
import jax
import jax.numpy as jnp
from jax.experimental import pallas as pl
from jax.experimental.pallas import tpu as pltpu


def _band_weights(w_hwio, W):
    """Fold the dx taps of a 3x3 SAME conv into per-dy banded row matrices.

    w_hwio: (kh, kw, Cin, Cout) conv weights (HWIO).
    Returns B: (kh, W*Cin, W*Cout) with
      B[dy, wi*Cin + ci, wo*Cout + co] = w[dy, wi - wo + 1, ci, co]  if |wi - wo| <= 1
                                         0                           otherwise
    so   out_row[h] = sum_dy  x_rows_padH[h + dy] @ B[dy]
    reproduces the zero-padded 3x3 convolution over a whole image row at once.
    """
    kh, kw, Cin, Cout = w_hwio.shape
    wi = jnp.arange(W)[:, None]           # input column
    wo = jnp.arange(W)[None, :]           # output column
    dx = wi - wo + (kw // 2)              # kernel tap connecting them
    valid = (dx >= 0) & (dx < kw)
    dx_c = jnp.clip(dx, 0, kw - 1)
    B = jnp.where(valid[None, :, :, None, None], w_hwio[:, dx_c], 0.0)
    # (kh, W_in, W_out, Cin, Cout) -> (kh, W_in, Cin, W_out, Cout) -> (kh, W*Cin, W*Cout)
    return B.transpose(0, 1, 3, 2, 4).reshape(kh, W * Cin, W * Cout)


def _basic_block_kernel(x_ref, bw1_ref, t1_ref, bw2_ref, t2_ref, out_ref,
                        xp1_ref, xp2_ref):
    """One grid step processes TB images.

    x_ref  : (TB, H, W*Cin)        f32   lane-dense input rows
    bw1_ref: (3*W*Cin, W*Cout)     bf16  fused deep-K banded conv1 weights (BN1 scale folded)
    t1_ref : (1, W*Cout)           f32   folded BN1 bias
    bw2_ref: (3*W*Cout, W*Cout)    bf16  fused deep-K banded conv2 weights (BN2 scale folded)
    t2_ref : (1, W*Cout)           f32   folded BN2 bias
    out_ref: (TB, H, W*Cout)       f32
    xp1_ref: (TB*(H+2), W*Cin)     f32   scratch: stacked H-padded conv1 inputs
    xp2_ref: (TB*(H+2), W*Cout)    f32   scratch: stacked H-padded conv2 inputs
    """
    TB, H, wc_in = x_ref.shape
    wc_out = xp2_ref.shape[1]
    Hp = H + 2                                  # per-image stride in the stack
    m_total = xp1_ref.shape[0]                  # TB * Hp
    R = m_total - 2                             # matmul M dimension
    mxu_dt = bw1_ref.dtype                      # bf16 MXU operands, f32 accumulation

    zero_in = jnp.zeros((1, wc_in), xp1_ref.dtype)
    zero_out = jnp.zeros((1, wc_out), xp2_ref.dtype)

    # ---- stack TB images into xp1 with zero separator (halo) rows -------------
    # Halos are re-zeroed every step: cheap, and correct even when the "parallel"
    # batch axis is sharded across TensorCores (scratch starts undefined per core).
    for b in range(TB):
        base = b * Hp
        xp1_ref[pl.ds(base, 1), :] = zero_in
        xp1_ref[pl.ds(base + 1, H), :] = x_ref[b]
        xp1_ref[pl.ds(base + H + 1, 1), :] = zero_in

    # ---- conv1: one fused deep-K matmul (K = 3*W*Cin), bf16 x bf16 -> f32 -----
    lhs1 = jnp.concatenate(
        [xp1_ref[pl.ds(dy, R), :].astype(mxu_dt) for dy in range(3)], axis=1)
    acc1 = jnp.dot(lhs1, bw1_ref[...], preferred_element_type=jnp.float32)

    # BN1 bias (scale already in weights) + ReLU, f32.
    y1 = jnp.maximum(acc1 + t1_ref[...], 0.0)

    # ---- build conv2 input stack: bulk write, then re-zero the halo rows ------
    # (the big write also deposits junk rows at the separators; the zero stores
    #  below overwrite them, so conv2 sees a correctly H-padded stack.)
    xp2_ref[pl.ds(1, R), :] = y1
    for b in range(TB):
        base = b * Hp
        xp2_ref[pl.ds(base, 1), :] = zero_out
        xp2_ref[pl.ds(base + H + 1, 1), :] = zero_out

    # ---- conv2: one fused deep-K matmul ---------------------------------------
    lhs2 = jnp.concatenate(
        [xp2_ref[pl.ds(dy, R), :].astype(mxu_dt) for dy in range(3)], axis=1)
    acc2 = jnp.dot(lhs2, bw2_ref[...], preferred_element_type=jnp.float32)
    y2 = acc2 + t2_ref[...]

    # ---- BN2 bias + residual add + ReLU; skip junk separator rows -------------
    for b in range(TB):
        base = b * Hp
        out_ref[b] = jnp.maximum(y2[base:base + H, :] + x_ref[b], 0.0)


def basic_block_forward(x_nchw, params, *, tb=8, mxu_dtype=jnp.bfloat16):
    """x_nchw: (N, C, H, W) float32. params: dict of conv (HWIO) / BN parameters."""
    x = jnp.transpose(x_nchw, (0, 2, 3, 1)).astype(jnp.float32)   # -> NHWC
    N, H, W, Cin = x.shape
    w1, w2 = params["w1"], params["w2"]
    Cout = w1.shape[-1]
    eps = 1e-5

    # Loud failures instead of masked stores / lowering errors (per review).
    assert Cin == Cout, "stride=1 / no-downsample BasicBlock requires Cin == Cout"
    wc_in, wc_out = W * Cin, W * Cout
    assert wc_in % 128 == 0 and wc_out % 128 == 0, \
        "lane-dense row layout requires W*C to be a multiple of 128"
    assert N % tb == 0, "batch must be divisible by the per-step image block TB"

    # Fold eval-mode BatchNorm: scale into the conv weights (f32, before the bf16
    # cast), bias kept as a per-lane vector (lane index = w*Cout + c).
    s1 = params["bn1_gamma"] / jnp.sqrt(params["bn1_var"] + eps)
    t1 = params["bn1_beta"] - params["bn1_mean"] * s1
    s2 = params["bn2_gamma"] / jnp.sqrt(params["bn2_var"] + eps)
    t2 = params["bn2_beta"] - params["bn2_mean"] * s2
    w1s = w1.astype(jnp.float32) * s1[None, None, None, :]
    w2s = w2.astype(jnp.float32) * s2[None, None, None, :]

    # Banded row-conv weights with the 3 dy taps fused along K, stored in bf16.
    BW1 = _band_weights(w1s, W).reshape(3 * wc_in, wc_out).astype(mxu_dtype)
    BW2 = _band_weights(w2s, W).reshape(3 * wc_out, wc_out).astype(mxu_dtype)
    t1 = jnp.tile(t1, W).reshape(1, wc_out)
    t2 = jnp.tile(t2, W).reshape(1, wc_out)

    # Lane-dense row layout (N, H, W*C); H-padding handled in-kernel.
    x_rows = x.reshape(N, H, wc_in)
    m_total = tb * (H + 2)

    flops = 2 * N * H * 3 * (wc_in * wc_out + wc_out * wc_out)
    bytes_accessed = (x_rows.size + N * H * wc_out) * 4 \
        + (BW1.size + BW2.size) * 2 + 2 * wc_out * 4

    out_rows = pl.pallas_call(
        _basic_block_kernel,
        out_shape=jax.ShapeDtypeStruct((N, H, wc_out), jnp.float32),
        grid_spec=pltpu.PrefetchScalarGridSpec(
            num_scalar_prefetch=0,
            grid=(N // tb,),
            in_specs=[
                pl.BlockSpec((tb, H, wc_in), lambda n: (n, 0, 0)),
                pl.BlockSpec((3 * wc_in, wc_out), lambda n: (0, 0)),   # resident weights
                pl.BlockSpec((1, wc_out), lambda n: (0, 0)),
                pl.BlockSpec((3 * wc_out, wc_out), lambda n: (0, 0)),  # resident weights
                pl.BlockSpec((1, wc_out), lambda n: (0, 0)),
            ],
            out_specs=pl.BlockSpec((tb, H, wc_out), lambda n: (n, 0, 0)),
            scratch_shapes=[
                pltpu.VMEM((m_total, wc_in), jnp.float32),
                pltpu.VMEM((m_total, wc_out), jnp.float32),
            ],
        ),
        compiler_params=pltpu.CompilerParams(
            dimension_semantics=("parallel",),
        ),
        cost_estimate=pl.CostEstimate(flops=flops, transcendentals=0,
                                      bytes_accessed=bytes_accessed),
    )(x_rows, BW1, t1, BW2, t2)

    out = out_rows.reshape(N, H, W, Cout)
    return jnp.transpose(out, (0, 3, 1, 2))   # back to NCHW


def _reference_forward(x_nchw, params):
    """Pure-JAX (lax.conv, f32) reference matching the PyTorch module in eval mode."""
    x = jnp.transpose(x_nchw, (0, 2, 3, 1)).astype(jnp.float32)
    eps = 1e-5
    dn = ("NHWC", "HWIO", "NHWC")

    def bn(y, g, b, m, v):
        return (y - m) / jnp.sqrt(v + eps) * g + b

    y = jax.lax.conv_general_dilated(x, params["w1"], (1, 1), "SAME",
                                     dimension_numbers=dn)
    y = jnp.maximum(bn(y, params["bn1_gamma"], params["bn1_beta"],
                       params["bn1_mean"], params["bn1_var"]), 0.0)
    y = jax.lax.conv_general_dilated(y, params["w2"], (1, 1), "SAME",
                                     dimension_numbers=dn)
    y = bn(y, params["bn2_gamma"], params["bn2_beta"],
           params["bn2_mean"], params["bn2_var"])
    y = jnp.maximum(y + x, 0.0)
    return jnp.transpose(y, (0, 3, 1, 2))


if __name__ == "__main__":
    # BasicBlock(inplanes=8, planes=8, stride=1), eval mode.  W*C = 128 -> lane-dense rows.
    # N=32 with TB=8 images per step -> grid of 4 "parallel" steps (>=2 per v7x core).
    N, C, H, W = 32, 8, 16, 16
    TB = 8
    keys = jax.random.split(jax.random.PRNGKey(0), 11)

    x = jax.random.normal(keys[0], (N, C, H, W), jnp.float32)
    params = {
        "w1": 0.1 * jax.random.normal(keys[1], (3, 3, C, C), jnp.float32),   # HWIO
        "w2": 0.1 * jax.random.normal(keys[2], (3, 3, C, C), jnp.float32),
        "bn1_gamma": 1.0 + 0.1 * jax.random.normal(keys[3], (C,), jnp.float32),
        "bn1_beta": 0.1 * jax.random.normal(keys[4], (C,), jnp.float32),
        "bn1_mean": 0.1 * jax.random.normal(keys[5], (C,), jnp.float32),
        "bn1_var": 1.0 + 0.1 * jnp.abs(jax.random.normal(keys[6], (C,), jnp.float32)),
        "bn2_gamma": 1.0 + 0.1 * jax.random.normal(keys[7], (C,), jnp.float32),
        "bn2_beta": 0.1 * jax.random.normal(keys[8], (C,), jnp.float32),
        "bn2_mean": 0.1 * jax.random.normal(keys[9], (C,), jnp.float32),
        "bn2_var": 1.0 + 0.1 * jnp.abs(jax.random.normal(keys[10], (C,), jnp.float32)),
    }

    fwd = jax.jit(lambda xx, pp: basic_block_forward(xx, pp, tb=TB))
    out = jax.block_until_ready(fwd(x, params))
    ref = jax.block_until_ready(_reference_forward(x, params))

    assert out.shape == (N, C, H, W)
    # bf16 MXU operands with f32 accumulation vs the f32 reference (scale folded in f32
    # before the bf16 cast) -> tightened tolerance vs the previous 5e-2.
    assert jnp.allclose(out, ref, atol=2e-2, rtol=2e-2), \
        f"max abs diff {jnp.max(jnp.abs(out - ref))}"
    print("KERNEL_OK")
</pallas_src>

<mosaic_0001>
module attributes {stable_mosaic.version = 11 : i64} {
  func.func @_basic_block_kernel(%arg0: i32, %arg1: memref<8x16x128xf32, #tpu.memory_space<vmem>>, %arg2: memref<384x128xbf16, #tpu.memory_space<vmem>>, %arg3: memref<1x128xf32, #tpu.memory_space<vmem>>, %arg4: memref<384x128xbf16, #tpu.memory_space<vmem>>, %arg5: memref<1x128xf32, #tpu.memory_space<vmem>>, %arg6: memref<8x16x128xf32, #tpu.memory_space<vmem>>, %arg7: memref<144x128xf32, #tpu.memory_space<vmem>>, %arg8: memref<144x128xf32, #tpu.memory_space<vmem>>) attributes {dimension_semantics = [#tpu.dimension_semantics<parallel>], iteration_bounds = array<i64: 4>, scalar_prefetch = 0 : i64, scratch_operands = 2 : i64, tpu.core_type = #tpu.core_type<tc>, window_params = [{transform_indices = @transform_0, window_bounds = array<i64: 8, 16, 128>}, {pipeline_mode = #tpu.pipeline_mode<synchronous>, transform_indices = @transform_1, window_bounds = array<i64: 384, 128>}, {pipeline_mode = #tpu.pipeline_mode<synchronous>, transform_indices = @transform_2, window_bounds = array<i64: 1, 128>}, {pipeline_mode = #tpu.pipeline_mode<synchronous>, transform_indices = @transform_3, window_bounds = array<i64: 384, 128>}, {pipeline_mode = #tpu.pipeline_mode<synchronous>, transform_indices = @transform_4, window_bounds = array<i64: 1, 128>}, {transform_indices = @transform_5, window_bounds = array<i64: 8, 16, 128>}]} {
    %cst = arith.constant 0.000000e+00 : f32
    %0 = vector.broadcast %cst : f32 to vector<1x128xf32>
    %cst_0 = arith.constant 0.000000e+00 : f32
    %1 = vector.broadcast %cst_0 : f32 to vector<1x128xf32>
    %c0 = arith.constant 0 : index
    %c0_1 = arith.constant 0 : index
    %2 = vector.load %arg7[%c0, %c0_1] : memref<144x128xf32, #tpu.memory_space<vmem>>, vector<1x128xf32>
    tpu.vector_store %arg7[%c0, %c0_1], %0 {strides = array<i32>} : memref<144x128xf32, #tpu.memory_space<vmem>>, vector<1x128xf32>,
    %c0_2 = arith.constant 0 : index
    %c0_3 = arith.constant 0 : index
    %c0_4 = arith.constant 0 : index
    %3 = vector.load %arg1[%c0_2, %c0_3, %c0_4] : memref<8x16x128xf32, #tpu.memory_space<vmem>>, vector<1x16x128xf32>
    %4 = vector.shape_cast %3 : vector<1x16x128xf32> to vector<16x128xf32>
    %c1 = arith.constant 1 : index
    %c0_5 = arith.constant 0 : index
    %5 = vector.load %arg7[%c1, %c0_5] : memref<144x128xf32, #tpu.memory_space<vmem>>, vector<16x128xf32>
    tpu.vector_store %arg7[%c1, %c0_5], %4 {strides = array<i32>} : memref<144x128xf32, #tpu.memory_space<vmem>>, vector<16x128xf32>,
    %c17 = arith.constant 17 : index
    %c0_6 = arith.constant 0 : index
    %6 = vector.load %arg7[%c17, %c0_6] : memref<144x128xf32, #tpu.memory_space<vmem>>, vector<1x128xf32>
    tpu.vector_store %arg7[%c17, %c0_6], %0 {strides = array<i32>} : memref<144x128xf32, #tpu.memory_space<vmem>>, vector<1x128xf32>,
    %c18 = arith.constant 18 : index
    %c0_7 = arith.constant 0 : index
    %7 = vector.load %arg7[%c18, %c0_7] : memref<144x128xf32, #tpu.memory_space<vmem>>, vector<1x128xf32>
    tpu.vector_store %arg7[%c18, %c0_7], %0 {strides = array<i32>} : memref<144x128xf32, #tpu.memory_space<vmem>>, vector<1x128xf32>,
    %c1_8 = arith.constant 1 : index
    %c0_9 = arith.constant 0 : index
    %c0_10 = arith.constant 0 : index
    %8 = vector.load %arg1[%c1_8, %c0_9, %c0_10] : memref<8x16x128xf32, #tpu.memory_space<vmem>>, vector<1x16x128xf32>
    %9 = vector.shape_cast %8 : vector<1x16x128xf32> to vector<16x128xf32>
    %c19 = arith.constant 19 : index
    %c0_11 = arith.constant 0 : index
    %10 = vector.load %arg7[%c19, %c0_11] : memref<144x128xf32, #tpu.memory_space<vmem>>, vector<16x128xf32>
    tpu.vector_store %arg7[%c19, %c0_11], %9 {strides = array<i32>} : memref<144x128xf32, #tpu.memory_space<vmem>>, vector<16x128xf32>,
    %c35 = arith.constant 35 : index
    %c0_12 = arith.constant 0 : index
    %11 = vector.load %arg7[%c35, %c0_12] : memref<144x128xf32, #tpu.memory_space<vmem>>, vector<1x128xf32>
    tpu.vector_store %arg7[%c35, %c0_12], %0 {strides = array<i32>} : memref<144x128xf32, #tpu.memory_space<vmem>>, vector<1x128xf32>,
    %c36 = arith.constant 36 : index
    %c0_13 = arith.constant 0 : index
    %12 = vector.load %arg7[%c36, %c0_13] : memref<144x128xf32, #tpu.memory_space<vmem>>, vector<1x128xf32>
    tpu.vector_store %arg7[%c36, %c0_13], %0 {strides = array<i32>} : memref<144x128xf32, #tpu.memory_space<vmem>>, vector<1x128xf32>,
    %c2 = arith.constant 2 : index
    %c0_14 = arith.constant 0 : index
    %c0_15 = arith.constant 0 : index
    %13 = vector.load %arg1[%c2, %c0_14, %c0_15] : memref<8x16x128xf32, #tpu.memory_space<vmem>>, vector<1x16x128xf32>
    %14 = vector.shape_cast %13 : vector<1x16x128xf32> to vector<16x128xf32>
    %c37 = arith.constant 37 : index
    %c0_16 = arith.constant 0 : index
    %15 = vector.load %arg7[%c37, %c0_16] : memref<144x128xf32, #tpu.memory_space<vmem>>, vector<16x128xf32>
    tpu.vector_store %arg7[%c37, %c0_16], %14 {strides = array<i32>} : memref<144x128xf32, #tpu.memory_space<vmem>>, vector<16x128xf32>,
    %c53 = arith.constant 53 : index
    %c0_17 = arith.constant 0 : index
    %16 = vector.load %arg7[%c53, %c0_17] : memref<144x128xf32, #tpu.memory_space<vmem>>, vector<1x128xf32>
    tpu.vector_store %arg7[%c53, %c0_17], %0 {strides = array<i32>} : memref<144x128xf32, #tpu.memory_space<vmem>>, vector<1x128xf32>,
    %c54 = arith.constant 54 : index
    %c0_18 = arith.constant 0 : index
    %17 = vector.load %arg7[%c54, %c0_18] : memref<144x128xf32, #tpu.memory_space<vmem>>, vector<1x128xf32>
    tpu.vector_store %arg7[%c54, %c0_18], %0 {strides = array<i32>} : memref<144x128xf32, #tpu.memory_space<vmem>>, vector<1x128xf32>,
    %c3 = arith.constant 3 : index
    %c0_19 = arith.constant 0 : index
    %c0_20 = arith.constant 0 : index
    %18 = vector.load %arg1[%c3, %c0_19, %c0_20] : memref<8x16x128xf32, #tpu.memory_space<vmem>>, vector<1x16x128xf32>
    %19 = vector.shape_cast %18 : vector<1x16x128xf32> to vector<16x128xf32>
    %c55 = arith.constant 55 : index
    %c0_21 = arith.constant 0 : index
    %20 = vector.load %arg7[%c55, %c0_21] : memref<144x128xf32, #tpu.memory_space<vmem>>, vector<16x128xf32>
    tpu.vector_store %arg7[%c55, %c0_21], %19 {strides = array<i32>} : memref<144x128xf32, #tpu.memory_space<vmem>>, vector<16x128xf32>,
    %c71 = arith.constant 71 : index
    %c0_22 = arith.constant 0 : index
    %21 = vector.load %arg7[%c71, %c0_22] : memref<144x128xf32, #tpu.memory_space<vmem>>, vector<1x128xf32>
    tpu.vector_store %arg7[%c71, %c0_22], %0 {strides = array<i32>} : memref<144x128xf32, #tpu.memory_space<vmem>>, vector<1x128xf32>,
    %c72 = arith.constant 72 : index
    %c0_23 = arith.constant 0 : index
    %22 = vector.load %arg7[%c72, %c0_23] : memref<144x128xf32, #tpu.memory_space<vmem>>, vector<1x128xf32>
    tpu.vector_store %arg7[%c72, %c0_23], %0 {strides = array<i32>} : memref<144x128xf32, #tpu.memory_space<vmem>>, vector<1x128xf32>,
    %c4 = arith.constant 4 : index
    %c0_24 = arith.constant 0 : index
    %c0_25 = arith.constant 0 : index
    %23 = vector.load %arg1[%c4, %c0_24, %c0_25] : memref<8x16x128xf32, #tpu.memory_space<vmem>>, vector<1x16x128xf32>
    %24 = vector.shape_cast %23 : vector<1x16x128xf32> to vector<16x128xf32>
    %c73 = arith.constant 73 : index
    %c0_26 = arith.constant 0 : index
    %25 = vector.load %arg7[%c73, %c0_26] : memref<144x128xf32, #tpu.memory_space<vmem>>, vector<16x128xf32>
    tpu.vector_store %arg7[%c73, %c0_26], %24 {strides = array<i32>} : memref<144x128xf32, #tpu.memory_space<vmem>>, vector<16x128xf32>,
    %c89 = arith.constant 89 : index
    %c0_27 = arith.constant 0 : index
    %26 = vector.load %arg7[%c89, %c0_27] : memref<144x128xf32, #tpu.memory_space<vmem>>, vector<1x128xf32>
    tpu.vector_store %arg7[%c89, %c0_27], %0 {strides = array<i32>} : memref<144x128xf32, #tpu.memory_space<vmem>>, vector<1x128xf32>,
    %c90 = arith.constant 90 : index
    %c0_28 = arith.constant 0 : index
    %27 = vector.load %arg7[%c90, %c0_28] : memref<144x128xf32, #tpu.memory_space<vmem>>, vector<1x128xf32>
    tpu.vector_store %arg7[%c90, %c0_28], %0 {strides = array<i32>} : memref<144x128xf32, #tpu.memory_space<vmem>>, vector<1x128xf32>,
    %c5 = arith.constant 5 : index
    %c0_29 = arith.constant 0 : index
    %c0_30 = arith.constant 0 : index
    %28 = vector.load %arg1[%c5, %c0_29, %c0_30] : memref<8x16x128xf32, #tpu.memory_space<vmem>>, vector<1x16x128xf32>
    %29 = vector.shape_cast %28 : vector<1x16x128xf32> to vector<16x128xf32>
    %c91 = arith.constant 91 : index
    %c0_31 = arith.constant 0 : index
    %30 = vector.load %arg7[%c91, %c0_31] : memref<144x128xf32, #tpu.memory_space<vmem>>, vector<16x128xf32>
    tpu.vector_store %arg7[%c91, %c0_31], %29 {strides = array<i32>} : memref<144x128xf32, #tpu.memory_space<vmem>>, vector<16x128xf32>,
    %c107 = arith.constant 107 : index
    %c0_32 = arith.constant 0 : index
    %31 = vector.load %arg7[%c107, %c0_32] : memref<144x128xf32, #tpu.memory_space<vmem>>, vector<1x128xf32>
    tpu.vector_store %arg7[%c107, %c0_32], %0 {strides = array<i32>} : memref<144x128xf32, #tpu.memory_space<vmem>>, vector<1x128xf32>,
    %c108 = arith.constant 108 : index
    %c0_33 = arith.constant 0 : index
    %32 = vector.load %arg7[%c108, %c0_33] : memref<144x128xf32, #tpu.memory_space<vmem>>, vector<1x128xf32>
    tpu.vector_store %arg7[%c108, %c0_33], %0 {strides = array<i32>} : memref<144x128xf32, #tpu.memory_space<vmem>>, vector<1x128xf32>,
    %c6 = arith.constant 6 : index
    %c0_34 = arith.constant 0 : index
    %c0_35 = arith.constant 0 : index
    %33 = vector.load %arg1[%c6, %c0_34, %c0_35] : memref<8x16x128xf32, #tpu.memory_space<vmem>>, vector<1x16x128xf32>
    %34 = vector.shape_cast %33 : vector<1x16x128xf32> to vector<16x128xf32>
    %c109 = arith.constant 109 : index
    %c0_36 = arith.constant 0 : index
    %35 = vector.load %arg7[%c109, %c0_36] : memref<144x128xf32, #tpu.memory_space<vmem>>, vector<16x128xf32>
    tpu.vector_store %arg7[%c109, %c0_36], %34 {strides = array<i32>} : memref<144x128xf32, #tpu.memory_space<vmem>>, vector<16x128xf32>,
    %c125 = arith.constant 125 : index
    %c0_37 = arith.constant 0 : index
    %36 = vector.load %arg7[%c125, %c0_37] : memref<144x128xf32, #tpu.memory_space<vmem>>, vector<1x128xf32>
    tpu.vector_store %arg7[%c125, %c0_37], %0 {strides = array<i32>} : memref<144x128xf32, #tpu.memory_space<vmem>>, vector<1x128xf32>,
    %c126 = arith.constant 126 : index
    %c0_38 = arith.constant 0 : index
    %37 = vector.load %arg7[%c126, %c0_38] : memref<144x128xf32, #tpu.memory_space<vmem>>, vector<1x128xf32>
    tpu.vector_store %arg7[%c126, %c0_38], %0 {strides = array<i32>} : memref<144x128xf32, #tpu.memory_space<vmem>>, vector<1x128xf32>,
    %c7 = arith.constant 7 : index
    %c0_39 = arith.constant 0 : index
    %c0_40 = arith.constant 0 : index
    %38 = vector.load %arg1[%c7, %c0_39, %c0_40] : memref<8x16x128xf32, #tpu.memory_space<vmem>>, vector<1x16x128xf32>
    %39 = vector.shape_cast %38 : vector<1x16x128xf32> to vector<16x128xf32>
    %c127 = arith.constant 127 : index
    %c0_41 = arith.constant 0 : index
    %40 = vector.load %arg7[%c127, %c0_41] : memref<144x128xf32, #tpu.memory_space<vmem>>, vector<16x128xf32>
    tpu.vector_store %arg7[%c127, %c0_41], %39 {strides = array<i32>} : memref<144x128xf32, #tpu.memory_space<vmem>>, vector<16x128xf32>,
    %c143 = arith.constant 143 : index
    %c0_42 = arith.constant 0 : index
    %41 = vector.load %arg7[%c143, %c0_42] : memref<144x128xf32, #tpu.memory_space<vmem>>, vector<1x128xf32>
    tpu.vector_store %arg7[%c143, %c0_42], %0 {strides = array<i32>} : memref<144x128xf32, #tpu.memory_space<vmem>>, vector<1x128xf32>,
    %c0_43 = arith.constant 0 : index
    %c0_44 = arith.constant 0 : index
    %42 = vector.load %arg7[%c0_43, %c0_44] : memref<144x128xf32, #tpu.memory_space<vmem>>, vector<142x128xf32>
    %43 = arith.truncf %42 : vector<142x128xf32> to vector<142x128xbf16>
    %c1_45 = arith.constant 1 : index
    %c0_46 = arith.constant 0 : index
    %44 = vector.load %arg7[%c1_45, %c0_46] : memref<144x128xf32, #tpu.memory_space<vmem>>, vector<142x128xf32>
    %45 = arith.truncf %44 : vector<142x128xf32> to vector<142x128xbf16>
    %c2_47 = arith.constant 2 : index
    %c0_48 = arith.constant 0 : index
    %46 = vector.load %arg7[%c2_47, %c0_48] : memref<144x128xf32, #tpu.memory_space<vmem>>, vector<142x128xf32>
    %47 = arith.truncf %46 : vector<142x128xf32> to vector<142x128xbf16>
    %48 = tpu.concatenate %43, %45, %47 in 1 : vector<142x128xbf16>, vector<142x128xbf16>, vector<142x128xbf16> -> vector<142x384xbf16>
    %c0_49 = arith.constant 0 : index
    %c0_50 = arith.constant 0 : index
    %49 = vector.load %arg2[%c0_49, %c0_50] : memref<384x128xbf16, #tpu.memory_space<vmem>>, vector<384x128xbf16>
    %cst_51 = arith.constant dense<0.000000e+00> : vector<142x128xf32>
    %50 = tpu.matmul %48, %49, %cst_51 {dimension_numbers = #tpu.dot_dimension_numbers<[1], [0], [0], [1], [0, 0, 1, 1], [], []>} : vector<142x384xbf16>, vector<384x128xbf16>, vector<142x128xf32> -> vector<142x128xf32>
    %c0_52 = arith.constant 0 : index
    %c0_53 = arith.constant 0 : index
    %51 = vector.load %arg3[%c0_52, %c0_53] : memref<1x128xf32, #tpu.memory_space<vmem>>, vector<1x128xf32>
    %52 = vector.broadcast %51 : vector<1x128xf32> to vector<142x128xf32>
    %53 = arith.addf %50, %52 : vector<142x128xf32>
    %cst_54 = arith.constant 0.000000e+00 : f32
    %54 = vector.broadcast %cst_54 : f32 to vector<142x128xf32>
    %55 = arith.maximumf %53, %54 : vector<142x128xf32>
    %c1_55 = arith.constant 1 : index
    %c0_56 = arith.constant 0 : index
    %56 = vector.load %arg8[%c1_55, %c0_56] : memref<144x128xf32, #tpu.memory_space<vmem>>, vector<142x128xf32>
    tpu.vector_store %arg8[%c1_55, %c0_56], %55 {strides = array<i32>} : memref<144x128xf32, #tpu.memory_space<vmem>>, vector<142x128xf32>,
    %c0_57 = arith.constant 0 : index
    %c0_58 = arith.constant 0 : index
    %57 = vector.load %arg8[%c0_57, %c0_58] : memref<144x128xf32, #tpu.memory_space<vmem>>, vector<1x128xf32>
    tpu.vector_store %arg8[%c0_57, %c0_58], %1 {strides = array<i32>} : memref<144x128xf32, #tpu.memory_space<vmem>>, vector<1x128xf32>,
    %c17_59 = arith.constant 17 : index
    %c0_60 = arith.constant 0 : index
    %58 = vector.load %arg8[%c17_59, %c0_60] : memref<144x128xf32, #tpu.memory_space<vmem>>, vector<1x128xf32>
    tpu.vector_store %arg8[%c17_59, %c0_60], %1 {strides = array<i32>} : memref<144x128xf32, #tpu.memory_space<vmem>>, vector<1x128xf32>,
    %c18_61 = arith.constant 18 : index
    %c0_62 = arith.constant 0 : index
    %59 = vector.load %arg8[%c18_61, %c0_62] : memref<144x128xf32, #tpu.memory_space<vmem>>, vector<1x128xf32>
    tpu.vector_store %arg8[%c18_61, %c0_62], %1 {strides = array<i32>} : memref<144x128xf32, #tpu.memory_space<vmem>>, vector<1x128xf32>,
    %c35_63 = arith.constant 35 : index
    %c0_64 = arith.constant 0 : index
    %60 = vector.load %arg8[%c35_63, %c0_64] : memref<144x128xf32, #tpu.memory_space<vmem>>, vector<1x128xf32>
    tpu.vector_store %arg8[%c35_63, %c0_64], %1 {strides = array<i32>} : memref<144x128xf32, #tpu.memory_space<vmem>>, vector<1x128xf32>,
    %c36_65 = arith.constant 36 : index
    %c0_66 = arith.constant 0 : index
    %61 = vector.load %arg8[%c36_65, %c0_66] : memref<144x128xf32, #tpu.memory_space<vmem>>, vector<1x128xf32>
    tpu.vector_store %arg8[%c36_65, %c0_66], %1 {strides = array<i32>} : memref<144x128xf32, #tpu.memory_space<vmem>>, vector<1x128xf32>,
    %c53_67 = arith.constant 53 : index
    %c0_68 = arith.constant 0 : index
    %62 = vector.load %arg8[%c53_67, %c0_68] : memref<144x128xf32, #tpu.memory_space<vmem>>, vector<1x128xf32>
    tpu.vector_store %arg8[%c53_67, %c0_68], %1 {strides = array<i32>} : memref<144x128xf32, #tpu.memory_space<vmem>>, vector<1x128xf32>,
    %c54_69 = arith.constant 54 : index
    %c0_70 = arith.constant 0 : index
    %63 = vector.load %arg8[%c54_69, %c0_70] : memref<144x128xf32, #tpu.memory_space<vmem>>, vector<1x128xf32>
    tpu.vector_store %arg8[%c54_69, %c0_70], %1 {strides = array<i32>} : memref<144x128xf32, #tpu.memory_space<vmem>>, vector<1x128xf32>,
    %c71_71 = arith.constant 71 : index
    %c0_72 = arith.constant 0 : index
    %64 = vector.load %arg8[%c71_71, %c0_72] : memref<144x128xf32, #tpu.memory_space<vmem>>, vector<1x128xf32>
    tpu.vector_store %arg8[%c71_71, %c0_72], %1 {strides = array<i32>} : memref<144x128xf32, #tpu.memory_space<vmem>>, vector<1x128xf32>,
    %c72_73 = arith.constant 72 : index
    %c0_74 = arith.constant 0 : index
    %65 = vector.load %arg8[%c72_73, %c0_74] : memref<144x128xf32, #tpu.memory_space<vmem>>, vector<1x128xf32>
    tpu.vector_store %arg8[%c72_73, %c0_74], %1 {strides = array<i32>} : memref<144x128xf32, #tpu.memory_space<vmem>>, vector<1x128xf32>,
    %c89_75 = arith.constant 89 : index
    %c0_76 = arith.constant 0 : index
    %66 = vector.load %arg8[%c89_75, %c0_76] : memref<144x128xf32, #tpu.memory_space<vmem>>, vector<1x128xf32>
    tpu.vector_store %arg8[%c89_75, %c0_76], %1 {strides = array<i32>} : memref<144x128xf32, #tpu.memory_space<vmem>>, vector<1x128xf32>,
    %c90_77 = arith.constant 90 : index
    %c0_78 = arith.constant 0 : index
    %67 = vector.load %arg8[%c90_77, %c0_78] : memref<144x128xf32, #tpu.memory_space<vmem>>, vector<1x128xf32>
    tpu.vector_store %arg8[%c90_77, %c0_78], %1 {strides = array<i32>} : memref<144x128xf32, #tpu.memory_space<vmem>>, vector<1x128xf32>,
    %c107_79 = arith.constant 107 : index
    %c0_80 = arith.constant 0 : index
    %68 = vector.load %arg8[%c107_79, %c0_80] : memref<144x128xf32, #tpu.memory_space<vmem>>, vector<1x128xf32>
    tpu.vector_store %arg8[%c107_79, %c0_80], %1 {strides = array<i32>} : memref<144x128xf32, #tpu.memory_space<vmem>>, vector<1x128xf32>,
    %c108_81 = arith.constant 108 : index
    %c0_82 = arith.constant 0 : index
    %69 = vector.load %arg8[%c108_81, %c0_82] : memref<144x128xf32, #tpu.memory_space<vmem>>, vector<1x128xf32>
    tpu.vector_store %arg8[%c108_81, %c0_82], %1 {strides = array<i32>} : memref<144x128xf32, #tpu.memory_space<vmem>>, vector<1x128xf32>,
    %c125_83 = arith.constant 125 : index
    %c0_84 = arith.constant 0 : index
    %70 = vector.load %arg8[%c125_83, %c0_84] : memref<144x128xf32, #tpu.memory_space<vmem>>, vector<1x128xf32>
    tpu.vector_store %arg8[%c125_83, %c0_84], %1 {strides = array<i32>} : memref<144x128xf32, #tpu.memory_space<vmem>>, vector<1x128xf32>,
    %c126_85 = arith.constant 126 : index
    %c0_86 = arith.constant 0 : index
    %71 = vector.load %arg8[%c126_85, %c0_86] : memref<144x128xf32, #tpu.memory_space<vmem>>, vector<1x128xf32>
    tpu.vector_store %arg8[%c126_85, %c0_86], %1 {strides = array<i32>} : memref<144x128xf32, #tpu.memory_space<vmem>>, vector<1x128xf32>,
    %c143_87 = arith.constant 143 : index
    %c0_88 = arith.constant 0 : index
    %72 = vector.load %arg8[%c143_87, %c0_88] : memref<144x128xf32, #tpu.memory_space<vmem>>, vector<1x128xf32>
    tpu.vector_store %arg8[%c143_87, %c0_88], %1 {strides = array<i32>} : memref<144x128xf32, #tpu.memory_space<vmem>>, vector<1x128xf32>,
    %c0_89 = arith.constant 0 : index
    %c0_90 = arith.constant 0 : index
    %73 = vector.load %arg8[%c0_89, %c0_90] : memref<144x128xf32, #tpu.memory_space<vmem>>, vector<142x128xf32>
    %74 = arith.truncf %73 : vector<142x128xf32> to vector<142x128xbf16>
    %c1_91 = arith.constant 1 : index
    %c0_92 = arith.constant 0 : index
    %75 = vector.load %arg8[%c1_91, %c0_92] : memref<144x128xf32, #tpu.memory_space<vmem>>, vector<142x128xf32>
    %76 = arith.truncf %75 : vector<142x128xf32> to vector<142x128xbf16>
    %c2_93 = arith.constant 2 : index
    %c0_94 = arith.constant 0 : index
    %77 = vector.load %arg8[%c2_93, %c0_94] : memref<144x128xf32, #tpu.memory_space<vmem>>, vector<142x128xf32>
    %78 = arith.truncf %77 : vector<142x128xf32> to vector<142x128xbf16>
    %79 = tpu.concatenate %74, %76, %78 in 1 : vector<142x128xbf16>, vector<142x128xbf16>, vector<142x128xbf16> -> vector<142x384xbf16>
    %c0_95 = arith.constant 0 : index
    %c0_96 = arith.constant 0 : index
    %80 = vector.load %arg4[%c0_95, %c0_96] : memref<384x128xbf16, #tpu.memory_space<vmem>>, vector<384x128xbf16>
    %cst_97 = arith.constant dense<0.000000e+00> : vector<142x128xf32>
    %81 = tpu.matmul %79, %80, %cst_97 {dimension_numbers = #tpu.dot_dimension_numbers<[1], [0], [0], [1], [0, 0, 1, 1], [], []>} : vector<142x384xbf16>, vector<384x128xbf16>, vector<142x128xf32> -> vector<142x128xf32>
    %c0_98 = arith.constant 0 : index
    %c0_99 = arith.constant 0 : index
    %82 = vector.load %arg5[%c0_98, %c0_99] : memref<1x128xf32, #tpu.memory_space<vmem>>, vector<1x128xf32>
    %83 = vector.broadcast %82 : vector<1x128xf32> to vector<142x128xf32>
    %84 = arith.addf %81, %83 : vector<142x128xf32>
    %85 = vector.extract_strided_slice %84 {offsets = [0, 0], sizes = [16, 128], strides = [1, 1]} : vector<142x128xf32> to vector<16x128xf32>
    %c0_100 = arith.constant 0 : index
    %c0_101 = arith.constant 0 : index
    %c0_102 = arith.constant 0 : index
    %86 = vector.load %arg1[%c0_100, %c0_101, %c0_102] : memref<8x16x128xf32, #tpu.memory_space<vmem>>, vector<1x16x128xf32>
    %87 = vector.shape_cast %86 : vector<1x16x128xf32> to vector<16x128xf32>
    %88 = arith.addf %85, %87 : vector<16x128xf32>
    %cst_103 = arith.constant 0.000000e+00 : f32
    %89 = vector.broadcast %cst_103 : f32 to vector<16x128xf32>
    %90 = arith.maximumf %88, %89 : vector<16x128xf32>
    %c0_104 = arith.constant 0 : index
    %c0_105 = arith.constant 0 : index
    %c0_106 = arith.constant 0 : index
    %91 = vector.load %arg6[%c0_104, %c0_105, %c0_106] : memref<8x16x128xf32, #tpu.memory_space<vmem>>, vector<1x16x128xf32>
    %92 = vector.shape_cast %91 : vector<1x16x128xf32> to vector<16x128xf32>
    %93 = vector.shape_cast %90 : vector<16x128xf32> to vector<1x16x128xf32>
    tpu.vector_store %arg6[%c0_104, %c0_105, %c0_106], %93 {strides = array<i32>} : memref<8x16x128xf32, #tpu.memory_space<vmem>>, vector<1x16x128xf32>,
    %94 = vector.extract_strided_slice %84 {offsets = [18, 0], sizes = [16, 128], strides = [1, 1]} : vector<142x128xf32> to vector<16x128xf32>
    %c1_107 = arith.constant 1 : index
    %c0_108 = arith.constant 0 : index
    %c0_109 = arith.constant 0 : index
    %95 = vector.load %arg1[%c1_107, %c0_108, %c0_109] : memref<8x16x128xf32, #tpu.memory_space<vmem>>, vector<1x16x128xf32>
    %96 = vector.shape_cast %95 : vector<1x16x128xf32> to vector<16x128xf32>
    %97 = arith.addf %94, %96 : vector<16x128xf32>
    %cst_110 = arith.constant 0.000000e+00 : f32
    %98 = vector.broadcast %cst_110 : f32 to vector<16x128xf32>
    %99 = arith.maximumf %97, %98 : vector<16x128xf32>
    %c1_111 = arith.constant 1 : index
    %c0_112 = arith.constant 0 : index
    %c0_113 = arith.constant 0 : index
    %100 = vector.load %arg6[%c1_111, %c0_112, %c0_113] : memref<8x16x128xf32, #tpu.memory_space<vmem>>, vector<1x16x128xf32>
    %101 = vector.shape_cast %100 : vector<1x16x128xf32> to vector<16x128xf32>
    %102 = vector.shape_cast %99 : vector<16x128xf32> to vector<1x16x128xf32>
    tpu.vector_store %arg6[%c1_111, %c0_112, %c0_113], %102 {strides = array<i32>} : memref<8x16x128xf32, #tpu.memory_space<vmem>>, vector<1x16x128xf32>,
    %103 = vector.extract_strided_slice %84 {offsets = [36, 0], sizes = [16, 128], strides = [1, 1]} : vector<142x128xf32> to vector<16x128xf32>
    %c2_114 = arith.constant 2 : index
    %c0_115 = arith.constant 0 : index
    %c0_116 = arith.constant 0 : index
    %104 = vector.load %arg1[%c2_114, %c0_115, %c0_116] : memref<8x16x128xf32, #tpu.memory_space<vmem>>, vector<1x16x128xf32>
    %105 = vector.shape_cast %104 : vector<1x16x128xf32> to vector<16x128xf32>
    %106 = arith.addf %103, %105 : vector<16x128xf32>
    %cst_117 = arith.constant 0.000000e+00 : f32
    %107 = vector.broadcast %cst_117 : f32 to vector<16x128xf32>
    %108 = arith.maximumf %106, %107 : vector<16x128xf32>
    %c2_118 = arith.constant 2 : index
    %c0_119 = arith.constant 0 : index
    %c0_120 = arith.constant 0 : index
    %109 = vector.load %arg6[%c2_118, %c0_119, %c0_120] : memref<8x16x128xf32, #tpu.memory_space<vmem>>, vector<1x16x128xf32>
    %110 = vector.shape_cast %109 : vector<1x16x128xf32> to vector<16x128xf32>
    %111 = vector.shape_cast %108 : vector<16x128xf32> to vector<1x16x128xf32>
    tpu.vector_store %arg6[%c2_118, %c0_119, %c0_120], %111 {strides = array<i32>} : memref<8x16x128xf32, #tpu.memory_space<vmem>>, vector<1x16x128xf32>,
    %112 = vector.extract_strided_slice %84 {offsets = [54, 0], sizes = [16, 128], strides = [1, 1]} : vector<142x128xf32> to vector<16x128xf32>
    %c3_121 = arith.constant 3 : index
    %c0_122 = arith.constant 0 : index
    %c0_123 = arith.constant 0 : index
    %113 = vector.load %arg1[%c3_121, %c0_122, %c0_123] : memref<8x16x128xf32, #tpu.memory_space<vmem>>, vector<1x16x128xf32>
    %114 = vector.shape_cast %113 : vector<1x16x128xf32> to vector<16x128xf32>
    %115 = arith.addf %112, %114 : vector<16x128xf32>
    %cst_124 = arith.constant 0.000000e+00 : f32
    %116 = vector.broadcast %cst_124 : f32 to vector<16x128xf32>
    %117 = arith.maximumf %115, %116 : vector<16x128xf32>
    %c3_125 = arith.constant 3 : index
    %c0_126 = arith.constant 0 : index
    %c0_127 = arith.constant 0 : index
    %118 = vector.load %arg6[%c3_125, %c0_126, %c0_127] : memref<8x16x128xf32, #tpu.memory_space<vmem>>, vector<1x16x128xf32>
    %119 = vector.shape_cast %118 : vector<1x16x128xf32> to vector<16x128xf32>
    %120 = vector.shape_cast %117 : vector<16x128xf32> to vector<1x16x128xf32>
    tpu.vector_store %arg6[%c3_125, %c0_126, %c0_127], %120 {strides = array<i32>} : memref<8x16x128xf32, #tpu.memory_space<vmem>>, vector<1x16x128xf32>,
    %121 = vector.extract_strided_slice %84 {offsets = [72, 0], sizes = [16, 128], strides = [1, 1]} : vector<142x128xf32> to vector<16x128xf32>
    %c4_128 = arith.constant 4 : index
    %c0_129 = arith.constant 0 : index
    %c0_130 = arith.constant 0 : index
    %122 = vector.load %arg1[%c4_128, %c0_129, %c0_130] : memref<8x16x128xf32, #tpu.memory_space<vmem>>, vector<1x16x128xf32>
    %123 = vector.shape_cast %122 : vector<1x16x128xf32> to vector<16x128xf32>
    %124 = arith.addf %121, %123 : vector<16x128xf32>
    %cst_131 = arith.constant 0.000000e+00 : f32
    %125 = vector.broadcast %cst_131 : f32 to vector<16x128xf32>
    %126 = arith.maximumf %124, %125 : vector<16x128xf32>
    %c4_132 = arith.constant 4 : index
    %c0_133 = arith.constant 0 : index
    %c0_134 = arith.constant 0 : index
    %127 = vector.load %arg6[%c4_132, %c0_133, %c0_134] : memref<8x16x128xf32, #tpu.memory_space<vmem>>, vector<1x16x128xf32>
    %128 = vector.shape_cast %127 : vector<1x16x128xf32> to vector<16x128xf32>
    %129 = vector.shape_cast %126 : vector<16x128xf32> to vector<1x16x128xf32>
    tpu.vector_store %arg6[%c4_132, %c0_133, %c0_134], %129 {strides = array<i32>} : memref<8x16x128xf32, #tpu.memory_space<vmem>>, vector<1x16x128xf32>,
    %130 = vector.extract_strided_slice %84 {offsets = [90, 0], sizes = [16, 128], strides = [1, 1]} : vector<142x128xf32> to vector<16x128xf32>
    %c5_135 = arith.constant 5 : index
    %c0_136 = arith.constant 0 : index
    %c0_137 = arith.constant 0 : index
    %131 = vector.load %arg1[%c5_135, %c0_136, %c0_137] : memref<8x16x128xf32, #tpu.memory_space<vmem>>, vector<1x16x128xf32>
    %132 = vector.shape_cast %131 : vector<1x16x128xf32> to vector<16x128xf32>
    %133 = arith.addf %130, %132 : vector<16x128xf32>
    %cst_138 = arith.constant 0.000000e+00 : f32
    %134 = vector.broadcast %cst_138 : f32 to vector<16x128xf32>
    %135 = arith.maximumf %133, %134 : vector<16x128xf32>
    %c5_139 = arith.constant 5 : index
    %c0_140 = arith.constant 0 : index
    %c0_141 = arith.constant 0 : index
    %136 = vector.load %arg6[%c5_139, %c0_140, %c0_141] : memref<8x16x128xf32, #tpu.memory_space<vmem>>, vector<1x16x128xf32>
    %137 = vector.shape_cast %136 : vector<1x16x128xf32> to vector<16x128xf32>
    %138 = vector.shape_cast %135 : vector<16x128xf32> to vector<1x16x128xf32>
    tpu.vector_store %arg6[%c5_139, %c0_140, %c0_141], %138 {strides = array<i32>} : memref<8x16x128xf32, #tpu.memory_space<vmem>>, vector<1x16x128xf32>,
    %139 = vector.extract_strided_slice %84 {offsets = [108, 0], sizes = [16, 128], strides = [1, 1]} : vector<142x128xf32> to vector<16x128xf32>
    %c6_142 = arith.constant 6 : index
    %c0_143 = arith.constant 0 : index
    %c0_144 = arith.constant 0 : index
    %140 = vector.load %arg1[%c6_142, %c0_143, %c0_144] : memref<8x16x128xf32, #tpu.memory_space<vmem>>, vector<1x16x128xf32>
    %141 = vector.shape_cast %140 : vector<1x16x128xf32> to vector<16x128xf32>
    %142 = arith.addf %139, %141 : vector<16x128xf32>
    %cst_145 = arith.constant 0.000000e+00 : f32
    %143 = vector.broadcast %cst_145 : f32 to vector<16x128xf32>
    %144 = arith.maximumf %142, %143 : vector<16x128xf32>
    %c6_146 = arith.constant 6 : index
    %c0_147 = arith.constant 0 : index
    %c0_148 = arith.constant 0 : index
    %145 = vector.load %arg6[%c6_146, %c0_147, %c0_148] : memref<8x16x128xf32, #tpu.memory_space<vmem>>, vector<1x16x128xf32>
    %146 = vector.shape_cast %145 : vector<1x16x128xf32> to vector<16x128xf32>
    %147 = vector.shape_cast %144 : vector<16x128xf32> to vector<1x16x128xf32>
    tpu.vector_store %arg6[%c6_146, %c0_147, %c0_148], %147 {strides = array<i32>} : memref<8x16x128xf32, #tpu.memory_space<vmem>>, vector<1x16x128xf32>,
    %148 = vector.extract_strided_slice %84 {offsets = [126, 0], sizes = [16, 128], strides = [1, 1]} : vector<142x128xf32> to vector<16x128xf32>
    %c7_149 = arith.constant 7 : index
    %c0_150 = arith.constant 0 : index
    %c0_151 = arith.constant 0 : index
    %149 = vector.load %arg1[%c7_149, %c0_150, %c0_151] : memref<8x16x128xf32, #tpu.memory_space<vmem>>, vector<1x16x128xf32>
    %150 = vector.shape_cast %149 : vector<1x16x128xf32> to vector<16x128xf32>
    %151 = arith.addf %148, %150 : vector<16x128xf32>
    %cst_152 = arith.constant 0.000000e+00 : f32
    %152 = vector.broadcast %cst_152 : f32 to vector<16x128xf32>
    %153 = arith.maximumf %151, %152 : vector<16x128xf32>
    %c7_153 = arith.constant 7 : index
    %c0_154 = arith.constant 0 : index
    %c0_155 = arith.constant 0 : index
    %154 = vector.load %arg6[%c7_153, %c0_154, %c0_155] : memref<8x16x128xf32, #tpu.memory_space<vmem>>, vector<1x16x128xf32>
    %155 = vector.shape_cast %154 : vector<1x16x128xf32> to vector<16x128xf32>
    %156 = vector.shape_cast %153 : vector<16x128xf32> to vector<1x16x128xf32>
    tpu.vector_store %arg6[%c7_153, %c0_154, %c0_155], %156 {strides = array<i32>} : memref<8x16x128xf32, #tpu.memory_space<vmem>>, vector<1x16x128xf32>,
    return
  }
  func.func @transform_0(%arg0: i32) -> (i32, i32, i32) {
    %c0_i32 = arith.constant 0 : i32
    %c0_i32_0 = arith.constant 0 : i32
    %c0_i32_1 = arith.constant 0 : i32
    return %arg0, %c0_i32, %c0_i32_0 : i32, i32, i32
  }
  func.func @transform_1(%arg0: i32) -> (i32, i32) {
    %c0_i32 = arith.constant 0 : i32
    %c0_i32_0 = arith.constant 0 : i32
    %c0_i32_1 = arith.constant 0 : i32
    return %c0_i32, %c0_i32_0 : i32, i32
  }
  func.func @transform_2(%arg0: i32) -> (i32, i32) {
    %c0_i32 = arith.constant 0 : i32
    %c0_i32_0 = arith.constant 0 : i32
    %c0_i32_1 = arith.constant 0 : i32
    return %c0_i32, %c0_i32_0 : i32, i32
  }
  func.func @transform_3(%arg0: i32) -> (i32, i32) {
    %c0_i32 = arith.constant 0 : i32
    %c0_i32_0 = arith.constant 0 : i32
    %c0_i32_1 = arith.constant 0 : i32
    return %c0_i32, %c0_i32_0 : i32, i32
  }
  func.func @transform_4(%arg0: i32) -> (i32, i32) {
    %c0_i32 = arith.constant 0 : i32
    %c0_i32_0 = arith.constant 0 : i32
    %c0_i32_1 = arith.constant 0 : i32
    return %c0_i32, %c0_i32_0 : i32, i32
  }
  func.func @transform_5(%arg0: i32) -> (i32, i32, i32) {
    %c0_i32 = arith.constant 0 : i32
    %c0_i32_0 = arith.constant 0 : i32
    %c0_i32_1 = arith.constant 0 : i32
    return %arg0, %c0_i32, %c0_i32_0 : i32, i32, i32
  }
}

</mosaic_0001>

<bundles_post_ra>
// kernel: tile.13
= control target key start
LH: loop header
LB: loop body
LE: loop exit
PB: predicated region body
PF: predicated region fallthrough
CT: control target
= control target key end

     0   :  { %s28_s0 = inlined_call_operand.vmem [shape: f32[8], index: 0, kind: input, shape index: {}]   ;;  %s29_s1 = inlined_call_operand.vmem [shape: f32[16,8], index: 1, kind: output, shape index: {}]  }
   0x1   :  { %v4_v0 = vld [vmem:[%s28_s0] ss:$0 sm:$0xff] }
   0x2   :  { %5 = vst [vmem:[%s29_s1] sm:$0xff] %v4_v0  ;;  %8 = vst [vmem:[%s29_s1 + $0x8] sm:$0xff] %v4_v0 }

// kernel: tile.14
= control target key start
LH: loop header
LB: loop body
LE: loop exit
PB: predicated region body
PF: predicated region fallthrough
CT: control target
= control target key end

     0   :  { %s133_s10 = smov 120   ;;  %s134_s11 = smov 104   ;;  %vm3_vm0 = vcmask 64512   ;;  %vm9_vm1 = vcmask 1048512   ;;  %vm15_vm2 = vcmask 982912   ;;  %vm21_vm3 = vcmask 917312   ;;  %s209_s0 = inlined_call_operand.vmem [shape: f32[16,8], index: 0, kind: input, shape index: {}]   ;;  %s210_s1 = inlined_call_operand.vmem [shape: f32[1,128], index: 1, kind: output, shape index: {}]  }
   0x1   :  { %v103_v0 = vld [vmem:[%s209_s0 + $0xf] sm:$0x1]   ;;  %v105_v1 = vld [vmem:[%s209_s0 + $0xd] sm:$0x1]   ;;  %v104_v2 = vld [vmem:[%s209_s0 + $0xe] sm:$0x1]  }
   0x2   :  { %7 = vrot.lane.b32.xlu0 %v103_v0, %s133_s10  ;;  %19 = vrot.lane.b32.xlu1 %v105_v1, %s134_s11  ;;  %v106_v3 = vld [vmem:[%s209_s0 + $0xc] sm:$0x1]   ;;  %s135_s16 = smov 112   ;;  %s136_s17 = smov 96   ;;  %v107_v4 = vld [vmem:[%s209_s0 + $0xb] sm:$0x1]  }
   0x3   :  { %v108_v5 = vld [vmem:[%s209_s0 + $0xa] sm:$0x1]   ;;  %v2_v6 = vld [vmem:[%s209_s0] sm:$0x1]   ;;  %s137_s24 = smov 88   ;;  %s138_s25 = smov 80  }
   0x4   :  { %4 = vst.msk [vmem:[#allocation0] sm:$0x1] %vm3_vm0, %v2_v6   ;;  %v109_v7 = vld [vmem:[%s209_s0 + $0x9] sm:$0x1]   ;;  %v110_v8 = vld [vmem:[%s209_s0 + $0x8] sm:$0x1]  }
   0x5   :  { %s139_s30 = smov 72   ;;  %s140_s2 = smov 64   ;;  %v111_v9 = vld [vmem:[%s209_s0 + $0x7] sm:$0x1]   ;;  %v112_v10 = vld [vmem:[%s209_s0 + $0x6] sm:$0x1]  }
   0x6   :  { %13 = vrot.lane.b32.xlu0 %v104_v2, %s135_s16  ;;  %25 = vrot.lane.b32.xlu1 %v106_v3, %s136_s17  ;;  %s141_s7 = smov 56   ;;  %s142_s8 = smov 48   ;;  %v113_v11 = vld [vmem:[%s209_s0 + $0x5] sm:$0x1]   ;;  %v114_v12 = vld [vmem:[%s209_s0 + $0x4] sm:$0x1]  }
   0x7   :  { %s143_s13 = smov 40   ;;  %s144_s14 = smov 32   ;;  %v115_v13 = vld [vmem:[%s209_s0 + $0x3] sm:$0x1]   ;;  %v116_v14 = vld [vmem:[%s209_s0 + $0x2] sm:$0x1]  }
   0x8   :  { %s145_s19 = smov 24   ;;  %s146_s20 = smov 16   ;;  %v117_v15 = vld [vmem:[%s209_s0 + $0x1] sm:$0x1]   ;;  %vm27_vm4 = vcmask 851712   ;;  %vm33_vm5 = vcmask 786112  }
   0x9   :  { %s147_s0 = smov 8   ;;  %vm39_vm6 = vcmask 720512   ;;  %vm45_vm7 = vcmask 654912   ;;  %vm51_vm8 = vcmask 589312   ;;  %vm57_vm9 = vcmask 523712  }
   0xa   :  { %31 = vrot.lane.b32.xlu0 %v107_v4, %s137_s24  ;;  %37 = vrot.lane.b32.xlu1 %v108_v5, %s138_s25  ;;  %vm63_vm10 = vcmask 458112   ;;  %vm69_vm11 = vcmask 392512   ;;  %vm75_vm12 = vcmask 326912   ;;  %vm81_vm13 = vcmask 261312  }
   0xb   :  { %vm87_vm14 = vcmask 195712   ;;  %vm93_vm15 = vcmask 130112  }
   0xe   :  { %43 = vrot.lane.b32.xlu0 %v109_v7, %s139_s30  ;;  %49 = vrot.lane.b32.xlu1 %v110_v8, %s140_s2 }
  0x12   :  { %55 = vrot.lane.b32.xlu0 %v111_v9, %s141_s7  ;;  %61 = vrot.lane.b32.xlu1 %v112_v10, %s142_s8 }
  0x16   :  { %67 = vrot.lane.b32.xlu0 %v113_v11, %s143_s13  ;;  %73 = vrot.lane.b32.xlu1 %v114_v12, %s144_s14 }
  0x1a   :  { %79 = vrot.lane.b32.xlu0 %v115_v13, %s145_s19  ;;  %85 = vrot.lane.b32.xlu1 %v116_v14, %s146_s20 }
  0x1e   :  { %91 = vrot.lane.b32.xlu0 %v117_v15, %s147_s0 }
  0x74   :  { %v8_v16 = vpop.permute.xlu0 %7   ;;  %v20_v17 = vpop.permute.xlu1 %19  }
  0x75   :  { %10 = vst.msk [vmem:[#allocation0] sm:$0x1] %vm9_vm1, %v8_v16  }
  0x78   :  { %v14_v18 = vpop.permute.xlu0 %13   ;;  %v26_v19 = vpop.permute.xlu1 %25  }
  0x79   :  { %16 = vst.msk [vmem:[#allocation0] sm:$0x1] %vm15_vm2, %v14_v18  }
  0x7a   :  { %22 = vst.msk [vmem:[#allocation0] sm:$0x1] %vm21_vm3, %v20_v17  }
  0x7b   :  { %28 = vst.msk [vmem:[#allocation0] sm:$0x1] %vm27_vm4, %v26_v19  }
  0x7c   :  { %v32_v20 = vpop.permute.xlu0 %31   ;;  %v38_v21 = vpop.permute.xlu1 %37  }
  0x7d   :  { %34 = vst.msk [vmem:[#allocation0] sm:$0x1] %vm33_vm5, %v32_v20  }
  0x7e   :  { %40 = vst.msk [vmem:[#allocation0] sm:$0x1] %vm39_vm6, %v38_v21  }
  0x80   :  { %v44_v22 = vpop.permute.xlu0 %43   ;;  %v50_v23 = vpop.permute.xlu1 %49  }
  0x81   :  { %46 = vst.msk [vmem:[#allocation0] sm:$0x1] %vm45_vm7, %v44_v22  }
  0x82   :  { %52 = vst.msk [vmem:[#allocation0] sm:$0x1] %vm51_vm8, %v50_v23  }
  0x84   :  { %v56_v24 = vpop.permute.xlu0 %55   ;;  %v62_v25 = vpop.permute.xlu1 %61  }
  0x85   :  { %58 = vst.msk [vmem:[#allocation0] sm:$0x1] %vm57_vm9, %v56_v24  }
  0x86   :  { %64 = vst.msk [vmem:[#allocation0] sm:$0x1] %vm63_vm10, %v62_v25  }
  0x88   :  { %v68_v26 = vpop.permute.xlu0 %67   ;;  %v74_v27 = vpop.permute.xlu1 %73  }
  0x89   :  { %70 = vst.msk [vmem:[#allocation0] sm:$0x1] %vm69_vm11, %v68_v26  }
  0x8a   :  { %76 = vst.msk [vmem:[#allocation0] sm:$0x1] %vm75_vm12, %v74_v27  }
  0x8c   :  { %v80_v28 = vpop.permute.xlu0 %79   ;;  %v86_v29 = vpop.permute.xlu1 %85  }
  0x8d   :  { %82 = vst.msk [vmem:[#allocation0] sm:$0x1] %vm81_vm13, %v80_v28  }
  0x8e   :  { %88 = vst.msk [vmem:[#allocation0] sm:$0x1] %vm87_vm14, %v86_v29  }
  0x90   :  { %v92_v30 = vpop.permute.xlu0 %91  }
  0x91   :  { %94 = vst.msk [vmem:[#allocation0] sm:$0x1] %vm93_vm15, %v92_v30  }
  0x98   :  { %v99_v31 = vld [vmem:[#allocation0] sm:$0x1] }
  0x99   :  { %102 = vst [vmem:[%s210_s1] sm:$0x1] %v99_v31 }

// kernel: _lambda_.1
= control target key start
LH: loop header
LB: loop body
LE: loop exit
PB: predicated region body
PF: predicated region fallthrough
CT: control target
= control target key end

     0   :  { %s2008_s18 = smov 0   ;;  %s2386_s0 = inlined_call_operand.vmem [shape: f32[32,16,128], index: 0, kind: input, shape index: {}]   ;;  %s2387_s1 = inlined_call_operand.vmem [shape: bf16[384,128], index: 1, kind: input, shape index: {}]   ;;  %s2388_s2 = inlined_call_operand.vmem [shape: f32[1,128], index: 2, kind: input, shape index: {}]   ;;  %s2389_s3 = inlined_call_operand.vmem [shape: bf16[384,128], index: 3, kind: input, shape index: {}]   ;;  %s2390_s4 = inlined_call_operand.vmem [shape: f32[1,128], index: 4, kind: input, shape index: {}]   ;;  %s2391_s5 = inlined_call_operand.vmem [shape: f32[32,16,128], index: 5, kind: output, shape index: {}]  }
   0x1 LB: > { %s1519_s19 = sadd.s32 4294967295, %s1974_s18   ;;  %p1523_p0 = scmp.ge.s32.totalorder %s1974_s18, 1  ;;  %s1974_s18 = sphi %s2008_s18, %s15_s18  }
   0x2   : > { %p189_p1 = scmp.lt.s32.totalorder %s1974_s18, 5 }
   0x4   : > { %p190_p2 = pnand %p1523_p0, %p189_p1 }
   0x5   : > { %s1524_s11 = sshll.u32 (!%p190_p2), %s1519_s19, 3 }
   0x6   : > { %193 = sbr.rel (%p190_p2) target bundleno = 537 (0x219), region = 40  ;;  %p220_p3 = scmp.lt.s32.totalorder (!%p190_p2), %s1524_s11, 31 }
   0xb   : > { %v1920_v0 = vld [vmem:[%s2387_s1 + $0x78] sm:$0xff]   ;;  %v1976_v1 = vmov 0.0   ;;  %v1923_v4 = vld [vmem:[%s2387_s1 + $0x70] sm:$0xff]   ;;  %vm1977_vm0 = vmmov 0   ;;  %v1926_v7 = vld [vmem:[%s2387_s1 + $0x68] sm:$0xff]   ;;  %s2393_s11 = smov (!%p220_p3, %s1524_s11), 31 }
   0xc   : > { %1806 = vmatprep.subr.bf16.mxu1 %v1976_v1  ;;  %234 = vst [vmem:[#allocation2] sm:$0x1] %v1976_v1  ;;  %239 = vst [vmem:[#allocation2 + $0x11] sm:$0x1] %v1976_v1  ;;  %v1921_v2 = vld [vmem:[%s2387_s1 + $0x38] sm:$0xff]   ;;  %1632 = vmatprep.subr.bf16.mxu0 %v1920_v0  ;;  %v1924_v5 = vld [vmem:[%s2387_s1 + $0x30] sm:$0xff]  }
   0xd   : > { %240 = vst [vmem:[#allocation2 + $0x12] sm:$0x1] %v1976_v1  ;;  %246 = vst [vmem:[#allocation2 + $0x23] sm:$0x1] %v1976_v1  ;;  %v1922_v3 = vld [vmem:[%s2387_s1 + $0xb8] sm:$0xff]   ;;  %1633 = vmatpush3.bf16.msra.mxu0 %v1921_v2  ;;  %1822 = vmatprep.mubr.msk.bf16.mxu1 %vm1977_vm0, %v1976_v1  ;;  %v1925_v6 = vld [vmem:[%s2387_s1 + $0xb0] sm:$0xff]  }
   0xe   : > { %247 = vst [vmem:[#allocation2 + $0x24] sm:$0x1] %v1976_v1  ;;  %253 = vst [vmem:[#allocation2 + $0x35] sm:$0x1] %v1976_v1  ;;  %1807 = vmatpush3.bf16.msra.mxu1 %v1922_v3  ;;  %1634 = vmatprep.subr.bf16.mxu0 %v1923_v4  ;;  %v1927_v8 = vld [vmem:[%s2387_s1 + $0x28] sm:$0xff]   ;;  %v1929_v10 = vld [vmem:[%s2387_s1 + $0x60] sm:$0xff]  }
   0xf   : > { %254 = vst [vmem:[#allocation2 + $0x36] sm:$0x1] %v1976_v1  ;;  %260 = vst [vmem:[#allocation2 + $0x47] sm:$0x1] %v1976_v1  ;;  %1808 = vmatprep.subr.bf16.mxu1 %v1976_v1  ;;  %v1928_v9 = vld [vmem:[%s2387_s1 + $0xa8] sm:$0xff]   ;;  %v1930_v11 = vld [vmem:[%s2387_s1 + $0x20] sm:$0xff]  }
  0x10   : > { %261 = vst [vmem:[#allocation2 + $0x48] sm:$0x1] %v1976_v1  ;;  %267 = vst [vmem:[#allocation2 + $0x59] sm:$0x1] %v1976_v1  ;;  %v1931_v12 = vld [vmem:[%s2387_s1 + $0xa0] sm:$0xff]   ;;  %v1932_v13 = vld [vmem:[%s2387_s1 + $0x58] sm:$0xff]  }
  0x11   : > { %268 = vst [vmem:[#allocation2 + $0x5a] sm:$0x1] %v1976_v1  ;;  %274 = vst [vmem:[#allocation2 + $0x6b] sm:$0x1] %v1976_v1  ;;  %1635 = vmatpush3.bf16.msra.mxu0 %v1924_v5  ;;  %v1933_v14 = vld [vmem:[%s2387_s1 + $0x18] sm:$0xff]   ;;  %v1935_v16 = vld [vmem:[%s2387_s1 + $0x50] sm:$0xff]  }
  0x12   : > { %275 = vst [vmem:[#allocation2 + $0x6c] sm:$0x1] %v1976_v1  ;;  %281 = vst [vmem:[#allocation2 + $0x7d] sm:$0x1] %v1976_v1  ;;  %1809 = vmatpush3.bf16.msra.mxu1 %v1925_v6  ;;  %1636 = vmatprep.subr.bf16.mxu0 %v1926_v7  ;;  %v1934_v15 = vld [vmem:[%s2387_s1 + $0x98] sm:$0xff]   ;;  %v1936_v17 = vld [vmem:[%s2387_s1 + $0x10] sm:$0xff]  }
  0x13   : > { %282 = vst [vmem:[#allocation2 + $0x7e] sm:$0x1] %v1976_v1  ;;  %288 = vst [vmem:[#allocation2 + $0x8f] sm:$0x1] %v1976_v1  ;;  %1810 = vmatprep.subr.bf16.mxu1 %v1976_v1  ;;  %s1630_s6 = sshll.u32 %s2393_s11, 4  ;;  %v1937_v18 = vld [vmem:[%s2387_s1 + $0x90] sm:$0xff]  }
  0x14   : > { %815 = vst [vmem:[#allocation3] sm:$0x1] %v1976_v1  ;;  %830 = vst [vmem:[#allocation3 + $0x8f] sm:$0x1] %v1976_v1  ;;  %v1938_v19 = vld [vmem:[%s2387_s1 + $0x48] sm:$0xff]   ;;  %s2112_s16 = scalar_lea.vmem %s2386_s0, %s1630_s6  ;;  %v1941_v22 = vld [vmem:[%s2387_s1 + $0x40] sm:$0xff]   ;;  %s2322_s15 = scalar_lea.vmem %s2391_s5, %s1630_s6 }
  0x15   : > { %1637 = vmatpush3.bf16.msra.mxu0 %v1927_v8  ;;  %v1939_v20 = vld [vmem:[%s2387_s1 + $0x8] sm:$0xff]   ;;  %v235_v23 = vld [vmem:[%s2112_s16] sm:$0xff]  ;;  %v1530_v25 = vld [vmem:[%s2112_s16 + $0x10] sm:$0xff]  ;;  %vm1333_vm1 = vcmask 1041408   ;;  %vm1354_vm2 = vcmask 1043456   ;;  %vm1375_vm3 = vcmask 1045504  }
  0x16   : > { %1811 = vmatpush3.bf16.msra.mxu1 %v1928_v9  ;;  %1638 = vmatprep.subr.bf16.mxu0 %v1929_v10  ;;  %v1940_v21 = vld [vmem:[%s2387_s1 + $0x88] sm:$0xff]   ;;  %v1942_v26 = vld [vmem:[%s2387_s1] sm:$0xff]   ;;  %237 = vst [vmem:[#allocation2 + $0x1] sm:$0xff] %v235_v23  ;;  %v1531_v28 = vld [vmem:[%s2112_s16 + $0x18] sm:$0xff] }
  0x17   : > { %1812 = vmatprep.subr.bf16.mxu1 %v1976_v1  ;;  %v236_v24 = vld [vmem:[%s2112_s16 + $0x8] sm:$0xff]  ;;  %244 = vst [vmem:[#allocation2 + $0x13] sm:$0xff] %v1530_v25  ;;  %v1532_v29 = vld [vmem:[%s2112_s16 + $0x20] sm:$0xff]  ;;  %245 = vst [vmem:[#allocation2 + $0x1b] sm:$0xff] %v1531_v28 }
  0x18   : > { %238 = vst [vmem:[#allocation2 + $0x9] sm:$0xff] %v236_v24  ;;  %v334_v27 = vpack.c.bf16 %v236_v24, %v235_v23  ;;  %v1533_v30 = vld [vmem:[%s2112_s16 + $0x28] sm:$0xff]  ;;  %v1943_v31 = vld [vmem:[%s2387_s1 + $0x80] sm:$0xff]   ;;  %251 = vst [vmem:[#allocation2 + $0x25] sm:$0xff] %v1532_v29 }
  0x19   : > { %1639 = vmatpush3.bf16.msra.mxu0 %v1930_v11  ;;  %252 = vst [vmem:[#allocation2 + $0x2d] sm:$0xff] %v1533_v30  ;;  %v1534_v32 = vld [vmem:[%s2112_s16 + $0x30] sm:$0xff]  ;;  %v1535_v33 = vld [vmem:[%s2112_s16 + $0x38] sm:$0xff]  ;;  %v2136_v34 = vld [vmem:[%s2112_s16 + $0x40] sm:$0xff] }
  0x1a   : > { %1813 = vmatpush3.bf16.msra.mxu1 %v1931_v12  ;;  %1640 = vmatprep.subr.bf16.mxu0 %v1932_v13  ;;  %258 = vst [vmem:[#allocation2 + $0x37] sm:$0xff] %v1534_v32  ;;  %259 = vst [vmem:[#allocation2 + $0x3f] sm:$0xff] %v1535_v33  ;;  %v2140_v35 = vld [vmem:[%s2112_s16 + $0x48] sm:$0xff]  ;;  %v1538_v36 = vld [vmem:[%s2112_s16 + $0x50] sm:$0xff] }
  0x1b   : > { %1814 = vmatprep.subr.bf16.mxu1 %v1976_v1  ;;  %601 = vmatprep.mubr.bf16.mxu0 %v334_v27  ;;  %265 = vst [vmem:[#allocation2 + $0x49] sm:$0xff] %v2136_v34  ;;  %v1539_v37 = vld [vmem:[%s2112_s16 + $0x58] sm:$0xff]  ;;  %266 = vst [vmem:[#allocation2 + $0x51] sm:$0xff] %v2140_v35  ;;  %v1540_v38 = vld [vmem:[%s2112_s16 + $0x60] sm:$0xff] }
  0x1c   : > { %272 = vst [vmem:[#allocation2 + $0x5b] sm:$0xff] %v1538_v36  ;;  %273 = vst [vmem:[#allocation2 + $0x63] sm:$0xff] %v1539_v37  ;;  %v1541_v39 = vld [vmem:[%s2112_s16 + $0x68] sm:$0xff]  ;;  %v1542_v40 = vld [vmem:[%s2112_s16 + $0x70] sm:$0xff] }
  0x1d   : > { %1641 = vmatpush3.bf16.msra.mxu0 %v1933_v14  ;;  %279 = vst [vmem:[#allocation2 + $0x6d] sm:$0xff] %v1540_v38  ;;  %280 = vst [vmem:[#allocation2 + $0x75] sm:$0xff] %v1541_v39  ;;  %v1543_v41 = vld [vmem:[%s2112_s16 + $0x78] sm:$0xff]  ;;  %v289_v44 = vld [vmem:[#allocation2] sm:$0xff] }
  0x1e   : > { %1815 = vmatpush3.bf16.msra.mxu1 %v1934_v15  ;;  %1642 = vmatprep.subr.bf16.mxu0 %v1935_v16  ;;  %286 = vst [vmem:[#allocation2 + $0x7f] sm:$0xff] %v1542_v40  ;;  %287 = vst [vmem:[#allocation2 + $0x87] sm:$0xff] %v1543_v41  ;;  %v1944_v42 = vld [vmem:[%s2389_s3 + $0x78] sm:$0xff]   ;;  %v1947_v9 = vld [vmem:[%s2389_s3 + $0x70] sm:$0xff]  }
  0x1f   : > { %1816 = vmatprep.subr.bf16.mxu1 %v1976_v1  ;;  %v1945_v43 = vld [vmem:[%s2389_s3 + $0x38] sm:$0xff]   ;;  %v290_v45 = vld [vmem:[#allocation2 + $0x8] sm:$0xff]  ;;  %v291_v53 = vld [vmem:[#allocation2 + $0x10] sm:$0xff] }
  0x20   : > { %v343_v46 = vld [vmem:[#allocation2 + $0x2] sm:$0xff]  ;;  %v307_v47 = vpack.c.bf16 %v290_v45, %v289_v44  ;;  %v344_v48 = vld [vmem:[#allocation2 + $0xa] sm:$0xff]  ;;  %v319_v50 = vld [vmem:[#allocation2 + $0x19] sm:$0xff] }
  0x21   : > { %1643 = vmatpush3.bf16.msra.mxu0 %v1936_v17  ;;  %v318_v49 = vld [vmem:[#allocation2 + $0x11] sm:$0xff]  ;;  %v361_v51 = vpack.c.bf16 %v344_v48, %v343_v46  ;;  %v346_v56 = vld [vmem:[#allocation2 + $0x1a] sm:$0xff]  ;;  %v321_v58 = vld [vmem:[#allocation2 + $0x29] sm:$0xff] }
  0x22   : > { %1817 = vmatpush3.bf16.msra.mxu1 %v1937_v18  ;;  %1644 = vmatprep.subr.bf16.mxu0 %v1938_v19  ;;  %v335_v52 = vpack.c.bf16 %v319_v50, %v318_v49  ;;  %v292_v54 = vld [vmem:[#allocation2 + $0x18] sm:$0xff]  ;;  %v320_v57 = vld [vmem:[#allocation2 + $0x21] sm:$0xff]  ;;  %v348_v2 = vld [vmem:[#allocation2 + $0x2a] sm:$0xff] }
  0x23   : > { %1818 = vmatprep.subr.bf16.mxu1 %v1976_v1  ;;  %v345_v55 = vld [vmem:[#allocation2 + $0x12] sm:$0xff]  ;;  %v308_v59 = vpack.c.bf16 %v292_v54, %v291_v53  ;;  %v336_v61 = vpack.c.bf16 %v321_v58, %v320_v57  ;;  %v293_v62 = vld [vmem:[#allocation2 + $0x20] sm:$0xff]  ;;  %v294_v63 = vld [vmem:[#allocation2 + $0x28] sm:$0xff] }
  0x24   : > { %v362_v60 = vpack.c.bf16 %v346_v56, %v345_v55  ;;  %v347_v0 = vld [vmem:[#allocation2 + $0x22] sm:$0xff]  ;;  %v322_v3 = vld [vmem:[#allocation2 + $0x31] sm:$0xff]  ;;  %v323_v4 = vld [vmem:[#allocation2 + $0x39] sm:$0xff]  ;;  %v309_v5 = vpack.c.bf16 %v294_v63, %v293_v62 }
  0x25   : > { %1645 = vmatpush3.bf16.msra.mxu0 %v1939_v20  ;;  %v363_v6 = vpack.c.bf16 %v348_v2, %v347_v0  ;;  %v337_v7 = vpack.c.bf16 %v323_v4, %v322_v3  ;;  %v1946_v8 = vld [vmem:[%s2389_s3 + $0xb8] sm:$0xff]   ;;  %v295_v10 = vld [vmem:[#allocation2 + $0x30] sm:$0xff]  ;;  %v324_v15 = vld [vmem:[#allocation2 + $0x41] sm:$0xff] }
  0x26   : > { %1819 = vmatpush3.bf16.msra.mxu1 %v1940_v21  ;;  %1646 = vmatprep.subr.bf16.mxu0 %v1941_v22  ;;  %v296_v11 = vld [vmem:[#allocation2 + $0x38] sm:$0xff]  ;;  %v1948_v12 = vld [vmem:[%s2389_s3 + $0x30] sm:$0xff]   ;;  %v1950_v17 = vld [vmem:[%s2389_s3 + $0x68] sm:$0xff]   ;;  %v338_v23 = vpack.c.bf16 %v2136_v34, %v324_v15 }
  0x27   : > { %1820 = vmatprep.subr.bf16.mxu1 %v1976_v1  ;;  %v349_v13 = vld [vmem:[#allocation2 + $0x32] sm:$0xff]  ;;  %v350_v14 = vld [vmem:[#allocation2 + $0x3a] sm:$0xff]  ;;  %v1951_v18 = vld [vmem:[%s2389_s3 + $0x28] sm:$0xff]   ;;  %v310_v20 = vpack.c.bf16 %v296_v11, %v295_v10 }
  0x28   : > { %v1949_v16 = vld [vmem:[%s2389_s3 + $0xb0] sm:$0xff]   ;;  %v1952_v19 = vld [vmem:[%s2389_s3 + $0xa8] sm:$0xff]   ;;  %v1953_v21 = vld [vmem:[%s2389_s3 + $0x60] sm:$0xff]   ;;  %v364_v22 = vpack.c.bf16 %v350_v14, %v349_v13 }
  0x29   : > { %1647 = vmatpush3.bf16.msra.mxu0 %v1942_v26  ;;  %v1954_v24 = vld [vmem:[%s2389_s3 + $0x20] sm:$0xff]   ;;  %v298_v26 = vld [vmem:[#allocation2 + $0x48] sm:$0xff]  ;;  %v1956_v27 = vld [vmem:[%s2389_s3 + $0x58] sm:$0xff]  }
  0x2a   : > { %1821 = vmatpush3.bf16.msra.mxu1 %v1943_v31  ;;  %1719 = vmatprep.subr.bf16.mxu0 %v1944_v42  ;;  %v297_v25 = vld [vmem:[#allocation2 + $0x40] sm:$0xff]  ;;  %v352_v29 = vld [vmem:[#allocation2 + $0x4a] sm:$0xff]  ;;  %v1957_v32 = vld [vmem:[%s2389_s3 + $0x18] sm:$0xff]  }
  0x2b   : > { %1858 = vmatprep.subr.bf16.mxu1 %v1976_v1  ;;  %v351_v28 = vld [vmem:[#allocation2 + $0x42] sm:$0xff]  ;;  %v327_v30 = vld [vmem:[#allocation2 + $0x59] sm:$0xff]  ;;  %v1959_v34 = vld [vmem:[%s2389_s3 + $0x50] sm:$0xff]   ;;  %v311_v36 = vpack.c.bf16 %v298_v26, %v297_v25 }
  0x2c   : > { %602 = vmatmul.mubr.bf16.vlgmr.msra.gmra.mxu0 %v307_v47  ;;  %v1955_v31 = vld [vmem:[%s2389_s3 + $0xa0] sm:$0xff]   ;;  %v1958_v33 = vld [vmem:[%s2389_s3 + $0x98] sm:$0xff]   ;;  %v365_v37 = vpack.c.bf16 %v352_v29, %v351_v28  ;;  %v339_v38 = vpack.c.bf16 %v327_v30, %v2140_v35  ;;  %v299_v39 = vld [vmem:[#allocation2 + $0x50] sm:$0xff] }
  0x2d   : > { %1823 = vmatmul.mubr.bf16.vlgmr.msra.gmra.mxu1 %v361_v51  ;;  %609 = vmatprep.mubr.bf16.mxu0 %v335_v52  ;;  %v300_v40 = vld [vmem:[#allocation2 + $0x58] sm:$0xff]  ;;  %v329_v44 = vld [vmem:[#allocation2 + $0x69] sm:$0xff]  ;;  %v301_v47 = vld [vmem:[#allocation2 + $0x60] sm:$0xff] }
  0x2e   : > { %1826 = vmatprep.mubr.msk.bf16.mxu1 %vm1977_vm0, %v1976_v1  ;;  %1720 = vmatpush3.bf16.msra.mxu0 %v1945_v43  ;;  %v353_v41 = vld [vmem:[#allocation2 + $0x52] sm:$0xff]  ;;  %v354_v42 = vld [vmem:[#allocation2 + $0x5a] sm:$0xff]  ;;  %v312_v35 = vpack.c.bf16 %v300_v40, %v299_v39  ;;  %v302_v48 = vld [vmem:[#allocation2 + $0x68] sm:$0xff] }
  0x2f   : > { %1859 = vmatpush3.bf16.msra.mxu1 %v1946_v8  ;;  %1721 = vmatprep.subr.bf16.mxu0 %v1947_v9  ;;  %v328_v43 = vld [vmem:[#allocation2 + $0x61] sm:$0xff]  ;;  %v366_v45 = vpack.c.bf16 %v354_v42, %v353_v41  ;;  %v356_v50 = vld [vmem:[#allocation2 + $0x6a] sm:$0xff]  ;;  %v331_v52 = vld [vmem:[#allocation2 + $0x79] sm:$0xff]  ;;  %v313_v53 = vpack.c.bf16 %v302_v48, %v301_v47 }
  0x30   : > { %1860 = vmatprep.subr.bf16.mxu1 %v1976_v1  ;;  %v340_v46 = vpack.c.bf16 %v329_v44, %v328_v43  ;;  %v355_v49 = vld [vmem:[#allocation2 + $0x62] sm:$0xff]  ;;  %v330_v51 = vld [vmem:[#allocation2 + $0x71] sm:$0xff] }
  0x31   : > { %v367_v54 = vpack.c.bf16 %v356_v50, %v355_v49  ;;  %v341_v55 = vpack.c.bf16 %v331_v52, %v330_v51  ;;  %v303_v56 = vld [vmem:[#allocation2 + $0x70] sm:$0xff]  ;;  %v304_v57 = vld [vmem:[#allocation2 + $0x78] sm:$0xff]  ;;  %v305_v2 = vld [vmem:[#allocation2 + $0x80] sm:$0xff] }
  0x32   : > { %1722 = vmatpush3.bf16.msra.mxu0 %v1948_v12  ;;  %v357_v58 = vld [vmem:[#allocation2 + $0x72] sm:$0xff]  ;;  %v314_v62 = vpack.c.bf16 %v304_v57, %v303_v56  ;;  %v306_v3 = vld [vmem:[#allocation2 + $0x88] sm:$0x3f]  ;;  %v1965_v12 = vld [vmem:[%s2389_s3 + $0x40] sm:$0xff]  }
  0x33   : > { %1723 = vmatprep.subr.bf16.mxu0 %v1950_v17  ;;  %1861 = vmatpush3.bf16.msra.mxu1 %v1949_v16  ;;  %v359_v4 = vld [vmem:[#allocation2 + $0x82] sm:$0xff]  ;;  %v1960_v8 = vld [vmem:[%s2389_s3 + $0x10] sm:$0xff]  }
  0x34   : > { %610 = vmatmul.mubr.bf16.gmra.mxu0 %v308_v59  ;;  %1862 = vmatprep.subr.bf16.mxu1 %v1976_v1  ;;  %v358_v59 = vld [vmem:[#allocation2 + $0x7a] sm:$0xff]  ;;  %v1961_v9 = vld [vmem:[%s2389_s3 + $0x90] sm:$0xff]   ;;  %v1962_v10 = vld [vmem:[%s2389_s3 + $0x48] sm:$0xff]  }
  0x35   : > { %1827 = vmatmul.mubr.bf16.gmra.mxu1 %v362_v60  ;;  %617 = vmatprep.mubr.bf16.mxu0 %v336_v61  ;;  %v332_v60 = vld [vmem:[#allocation2 + $0x81] sm:$0xff]  ;;  %v333_v61 = vld [vmem:[#allocation2 + $0x89] sm:$0x3f]  ;;  %v368_v63 = vpack.c.bf16 %v358_v59, %v357_v58 }
  0x36   : > { %1830 = vmatprep.mubr.msk.bf16.mxu1 %vm1977_vm0, %v1976_v1  ;;  %1724 = vmatpush3.bf16.msra.mxu0 %v1951_v18  ;;  %v342_v0 = vpack.c.bf16 %v333_v61, %v332_v60  ;;  %v1963_v11 = vld [vmem:[%s2389_s3 + $0x8] sm:$0xff]   ;;  %v1966_v13 = vld [vmem:[%s2389_s3] sm:$0xff]  }
  0x37   : > { %1725 = vmatprep.subr.bf16.mxu0 %v1953_v21  ;;  %1863 = vmatpush3.bf16.msra.mxu1 %v1952_v19  ;;  %v1964_v14 = vld [vmem:[%s2389_s3 + $0x88] sm:$0xff]   ;;  %v1967_v15 = vld [vmem:[%s2389_s3 + $0x80] sm:$0xff]  }
  0x38   : > { %1864 = vmatprep.subr.bf16.mxu1 %v1976_v1  ;;  %v2253_v18 = vld [vmem:[%s2388_s2] ss:$0 sm:$0xff] }
  0x3a   : > { %1726 = vmatpush3.bf16.msra.mxu0 %v1954_v24 }
  0x3b   : > { %1727 = vmatprep.subr.bf16.mxu0 %v1956_v27  ;;  %1865 = vmatpush3.bf16.msra.mxu1 %v1955_v31 }
  0x3c   : > { %618 = vmatmul.mubr.bf16.gmra.mxu0 %v309_v5  ;;  %1866 = vmatprep.subr.bf16.mxu1 %v1976_v1  ;;  %v360_v5 = vld [vmem:[#allocation2 + $0x8a] sm:$0x3f] }
  0x3d   : > { %1831 = vmatmul.mubr.bf16.gmra.mxu1 %v363_v6  ;;  %625 = vmatprep.mubr.bf16.mxu0 %v337_v7  ;;  %v315_v6 = vpack.c.bf16 %v306_v3, %v305_v2  ;;  %v369_v7 = vpack.c.bf16 %v360_v5, %v359_v4 }
  0x3e   : > { %1834 = vmatprep.mubr.msk.bf16.mxu1 %vm1977_vm0, %v1976_v1  ;;  %1728 = vmatpush3.bf16.msra.mxu0 %v1957_v32 }
  0x3f   : > { %1729 = vmatprep.subr.bf16.mxu0 %v1959_v34  ;;  %1867 = vmatpush3.bf16.msra.mxu1 %v1958_v33 }
  0x40   : > { %1868 = vmatprep.subr.bf16.mxu1 %v1976_v1 }
  0x42   : > { %1730 = vmatpush3.bf16.msra.mxu0 %v1960_v8 }
  0x43   : > { %1869 = vmatpush3.bf16.msra.mxu1 %v1961_v9  ;;  %1731 = vmatprep.subr.bf16.mxu0 %v1962_v10 }
  0x44   : > { %626 = vmatmul.mubr.bf16.gmra.mxu0 %v310_v20  ;;  %1870 = vmatprep.subr.bf16.mxu1 %v1976_v1 }
  0x45   : > { %1835 = vmatmul.mubr.bf16.gmra.mxu1 %v364_v22  ;;  %633 = vmatprep.mubr.bf16.mxu0 %v338_v23 }
  0x46   : > { %1838 = vmatprep.mubr.msk.bf16.mxu1 %vm1977_vm0, %v1976_v1  ;;  %1732 = vmatpush3.bf16.msra.mxu0 %v1963_v11 }
  0x47   : > { %1733 = vmatprep.subr.bf16.mxu0 %v1965_v12  ;;  %1871 = vmatpush3.bf16.msra.mxu1 %v1964_v14 }
  0x48   : > { %1872 = vmatprep.subr.bf16.mxu1 %v1976_v1 }
  0x4a   : > { %1734 = vmatpush3.bf16.msra.mxu0 %v1966_v13 }
  0x4b   : > { %1873 = vmatpush3.bf16.msra.mxu1 %v1967_v15 }
  0x4c   : > { %634 = vmatmul.mubr.bf16.gmra.mxu0 %v311_v36 }
  0x4d   : > { %1839 = vmatmul.mubr.bf16.gmra.mxu1 %v365_v37  ;;  %641 = vmatprep.mubr.bf16.mxu0 %v339_v38 }
  0x4e   : > { %1842 = vmatprep.mubr.msk.bf16.mxu1 %vm1977_vm0, %v1976_v1 }
  0x54   : > { %642 = vmatmul.mubr.bf16.gmra.mxu0 %v312_v35 }
  0x55   : > { %1843 = vmatmul.mubr.bf16.gmra.mxu1 %v366_v45  ;;  %649 = vmatprep.mubr.bf16.mxu0 %v340_v46 }
  0x56   : > { %1846 = vmatprep.mubr.msk.bf16.mxu1 %vm1977_vm0, %v1976_v1 }
  0x5c   : > { %650 = vmatmul.mubr.bf16.gmra.mxu0 %v313_v53 }
  0x5d   : > { %1847 = vmatmul.mubr.bf16.gmra.mxu1 %v367_v54  ;;  %657 = vmatprep.mubr.bf16.mxu0 %v341_v55 }
  0x5e   : > { %1850 = vmatprep.mubr.msk.bf16.mxu1 %vm1977_vm0, %v1976_v1 }
  0x64   : > { %658 = vmatmul.mubr.bf16.gmra.mxu0 %v314_v62 }
  0x65   : > { %1851 = vmatmul.mubr.bf16.gmra.mxu1 %v368_v63  ;;  %665 = vmatprep.mubr.bf16.mxu0 %v342_v0 }
  0x66   : > { %1854 = vmatprep.mubr.msk.bf16.mxu1 %vm1977_vm0, %v1976_v1 }
  0x6c   : > { %666 = vmatmul.mubr.bf16.gmra.mxu0 %v315_v6 }
  0x6d   : > { %1855 = vmatmul.mubr.bf16.gmra.mxu1 %v369_v7 }
  0x6e   : > { %1874 = vmatprep.mubr.msk.bf16.mxu1 %vm1977_vm0, %v1976_v1 }
  0xec   : > { %v1648_v16 = vpop.f32.mrf.mxu0 }
  0xed   : > { %v708_v17 = vpop.f32.mrf.mxu1 }
  0xee   : > { %v1649_v19 = vpop.f32.mrf.mxu0 }
  0xef   : > { %v1650_v20 = vadd.f32 %v1649_v19, %v1648_v16  ;;  %v1824_v21 = vpop.f32.mrf.mxu1 }
  0xf0   : > { %v1651_v22 = vpop.f32.mrf.mxu0 }
  0xf1   : > { %v604_v23 = vadd.f32 %v1650_v20, %v2253_v18  ;;  %v711_v24 = vpop.f32.mrf.mxu1 }
  0xf2   : > { %v1652_v25 = vpop.f32.mrf.mxu0 }
  0xf3   : > { %v709_v26 = vadd.f32 %v708_v17, %v604_v23  ;;  %v1653_v27 = vadd.f32 %v1652_v25, %v1651_v22  ;;  %v1825_v28 = vpop.f32.mrf.mxu1 }
  0xf4   : > { %v1654_v29 = vpop.f32.mrf.mxu0 }
  0xf5   : > { %v779_v30 = vmax.f32 %v709_v26, 0.0  ;;  %v607_v31 = vadd.f32 %v1653_v27, %v2253_v18  ;;  %v716_v32 = vpop.f32.mrf.mxu1 }
  0xf6   : > { %v1655_v33 = vpop.f32.mrf.mxu0 }
  0xf7   : > { %797 = vst [vmem:[#allocation3 + $0x1] sm:$0xff] %v779_v30  ;;  %v712_v34 = vadd.f32 %v711_v24, %v607_v31  ;;  %v1656_v36 = vadd.f32 %v1655_v33, %v1654_v29  ;;  %v1828_v37 = vpop.f32.mrf.mxu1 }
  0xf8   : > { %v1657_v38 = vpop.f32.mrf.mxu0 }
  0xf9   : > { %v780_v39 = vmax.f32 %v712_v34, 0.0  ;;  %v612_v40 = vadd.f32 %v1656_v36, %v2253_v18  ;;  %v719_v41 = vpop.f32.mrf.mxu1 }
  0xfa   : > { %v1658_v42 = vpop.f32.mrf.mxu0 }
  0xfb   : > { %798 = vst [vmem:[#allocation3 + $0x9] sm:$0xff] %v780_v39  ;;  %v717_v43 = vadd.f32 %v716_v32, %v612_v40  ;;  %v1659_v44 = vadd.f32 %v1658_v42, %v1657_v38  ;;  %v1829_v35 = vpop.f32.mrf.mxu1  ;;  %v876_v45 = vpack.c.bf16 %v780_v39, %v779_v30 }
  0xfc   : > { %v1660_v46 = vpop.f32.mrf.mxu0 }
  0xfd   : > { %v781_v47 = vmax.f32 %v717_v43, 0.0  ;;  %v615_v48 = vadd.f32 %v1659_v44, %v2253_v18  ;;  %v724_v49 = vpop.f32.mrf.mxu1  ;;  %1143 = vmatprep.mubr.bf16.mxu0 %v876_v45 }
  0xfe   : > { %v1661_v50 = vpop.f32.mrf.mxu0  ;;  %v831_v59 = vld [vmem:[#allocation3] sm:$0xff] }
  0xff   : > { %799 = vst [vmem:[#allocation3 + $0x11] sm:$0xff] %v781_v47  ;;  %v720_v51 = vadd.f32 %v719_v41, %v615_v48  ;;  %v1662_v52 = vadd.f32 %v1661_v50, %v1660_v46  ;;  %v1832_v53 = vpop.f32.mrf.mxu1 }
 0x100   : > { %816 = vst [vmem:[#allocation3 + $0x11] sm:$0x1] %v1976_v1  ;;  %817 = vst [vmem:[#allocation3 + $0x12] sm:$0x1] %v1976_v1  ;;  %v1663_v54 = vpop.f32.mrf.mxu0 }
 0x101   : > { %v782_v55 = vmax.f32 %v720_v51, 0.0  ;;  %v620_v56 = vadd.f32 %v1662_v52, %v2253_v18  ;;  %v727_v57 = vpop.f32.mrf.mxu1 }
 0x102   : > { %v1664_v58 = vpop.f32.mrf.mxu0  ;;  %v832_v60 = vld [vmem:[#allocation3 + $0x8] sm:$0xff] }
 0x103   : > { %800 = vst [vmem:[#allocation3 + $0x19] sm:$0xff] %v782_v55  ;;  %v725_v61 = vadd.f32 %v724_v49, %v620_v56  ;;  %v1665_v62 = vadd.f32 %v1664_v58, %v1663_v54  ;;  %v1833_v63 = vpop.f32.mrf.mxu1  ;;  %v849_v0 = vpack.c.bf16 %v832_v60, %v831_v59  ;;  %v885_v10 = vld [vmem:[#allocation3 + $0x2] sm:$0xff] }
 0x104   : > { %v1666_v2 = vpop.f32.mrf.mxu0 }
 0x105   : > { %v783_v3 = vmax.f32 %v725_v61, 0.0  ;;  %v623_v4 = vadd.f32 %v1665_v62, %v2253_v18  ;;  %v732_v5 = vpop.f32.mrf.mxu1  ;;  %1144 = vmatmul.mubr.bf16.vlgmr.msra.gmra.mxu0 %v849_v0 }
 0x106   : > { %v1667_v6 = vpop.f32.mrf.mxu0 }
 0x107   : > { %801 = vst [vmem:[#allocation3 + $0x21] sm:$0xff] %v783_v3  ;;  %v728_v7 = vadd.f32 %v727_v57, %v623_v4  ;;  %v1668_v8 = vadd.f32 %v1667_v6, %v1666_v2  ;;  %v1836_v9 = vpop.f32.mrf.mxu1  ;;  %v886_v11 = vld [vmem:[#allocation3 + $0xa] sm:$0xff] }
 0x108   : > { %v860_v12 = vld [vmem:[#allocation3 + $0x11] sm:$0xff]  ;;  %818 = vst [vmem:[#allocation3 + $0x23] sm:$0x1] %v1976_v1  ;;  %819 = vst [vmem:[#allocation3 + $0x24] sm:$0x1] %v1976_v1  ;;  %v1669_v13 = vpop.f32.mrf.mxu0  ;;  %v903_v14 = vpack.c.bf16 %v886_v11, %v885_v10 }
 0x109   : > { %v877_v15 = vpack.c.bf16 %v782_v55, %v860_v12  ;;  %v784_v16 = vmax.f32 %v728_v7, 0.0  ;;  %v628_v17 = vadd.f32 %v1668_v8, %v2253_v18  ;;  %v735_v19 = vpop.f32.mrf.mxu1  ;;  %v833_v21 = vld [vmem:[#allocation3 + $0x10] sm:$0xff] }
 0x10a   : > { %v1670_v20 = vpop.f32.mrf.mxu0  ;;  %1875 = vmatmul.mubr.bf16.vlgmr.msra.gmra.mxu1 %v903_v14  ;;  %v834_v22 = vld [vmem:[#allocation3 + $0x18] sm:$0xff] }
 0x10b   : > { %1151 = vmatprep.mubr.bf16.mxu0 %v877_v15  ;;  %802 = vst [vmem:[#allocation3 + $0x29] sm:$0xff] %v784_v16  ;;  %v733_v23 = vadd.f32 %v732_v5, %v628_v17  ;;  %v1671_v24 = vadd.f32 %v1670_v20, %v1669_v13  ;;  %v1837_v25 = vpop.f32.mrf.mxu1  ;;  %v850_v26 = vpack.c.bf16 %v834_v22, %v833_v21  ;;  %v887_v32 = vld [vmem:[#allocation3 + $0x12] sm:$0xff] }
 0x10c   : > { %1878 = vmatprep.mubr.msk.bf16.mxu1 %vm1977_vm0, %v1976_v1  ;;  %v1672_v27 = vpop.f32.mrf.mxu0 }
 0x10d   : > { %v785_v28 = vmax.f32 %v733_v23, 0.0  ;;  %v631_v29 = vadd.f32 %v1671_v24, %v2253_v18  ;;  %v740_v30 = vpop.f32.mrf.mxu1  ;;  %1152 = vmatmul.mubr.bf16.gmra.mxu0 %v850_v26 }
 0x10e   : > { %v1673_v31 = vpop.f32.mrf.mxu0  ;;  %v888_v33 = vld [vmem:[#allocation3 + $0x1a] sm:$0xff] }
 0x10f   : > { %803 = vst [vmem:[#allocation3 + $0x31] sm:$0xff] %v785_v28  ;;  %v736_v34 = vadd.f32 %v735_v19, %v631_v29  ;;  %v1674_v36 = vadd.f32 %v1673_v31, %v1672_v27  ;;  %v1840_v37 = vpop.f32.mrf.mxu1  ;;  %v904_v38 = vpack.c.bf16 %v888_v33, %v887_v32  ;;  %v862_v39 = vld [vmem:[#allocation3 + $0x21] sm:$0xff] }
 0x110   : > { %820 = vst [vmem:[#allocation3 + $0x35] sm:$0x1] %v1976_v1  ;;  %821 = vst [vmem:[#allocation3 + $0x36] sm:$0x1] %v1976_v1  ;;  %v1675_v40 = vpop.f32.mrf.mxu0  ;;  %v878_v41 = vpack.c.bf16 %v784_v16, %v862_v39  ;;  %v835_v45 = vld [vmem:[#allocation3 + $0x20] sm:$0xff] }
 0x111   : > { %v786_v42 = vmax.f32 %v736_v34, 0.0  ;;  %v636_v43 = vadd.f32 %v1674_v36, %v2253_v18  ;;  %v743_v44 = vpop.f32.mrf.mxu1 }
 0x112   : > { %v1676_v35 = vpop.f32.mrf.mxu0  ;;  %1879 = vmatmul.mubr.bf16.gmra.mxu1 %v904_v38  ;;  %1159 = vmatprep.mubr.bf16.mxu0 %v878_v41  ;;  %v836_v46 = vld [vmem:[#allocation3 + $0x28] sm:$0xff] }
 0x113   : > { %804 = vst [vmem:[#allocation3 + $0x39] sm:$0xff] %v786_v42  ;;  %v741_v47 = vadd.f32 %v740_v30, %v636_v43  ;;  %v1677_v48 = vadd.f32 %v1676_v35, %v1675_v40  ;;  %v1841_v49 = vpop.f32.mrf.mxu1  ;;  %v851_v50 = vpack.c.bf16 %v836_v46, %v835_v45  ;;  %1882 = vmatprep.mubr.msk.bf16.mxu1 %vm1977_vm0, %v1976_v1  ;;  %v889_v56 = vld [vmem:[#allocation3 + $0x22] sm:$0xff] }
 0x114   : > { %v1678_v51 = vpop.f32.mrf.mxu0 }
 0x115   : > { %v787_v52 = vmax.f32 %v741_v47, 0.0  ;;  %v639_v53 = vadd.f32 %v1677_v48, %v2253_v18  ;;  %v748_v54 = vpop.f32.mrf.mxu1  ;;  %1160 = vmatmul.mubr.bf16.gmra.mxu0 %v851_v50 }
 0x116   : > { %v1679_v55 = vpop.f32.mrf.mxu0  ;;  %v890_v57 = vld [vmem:[#allocation3 + $0x2a] sm:$0xff] }
 0x117   : > { %805 = vst [vmem:[#allocation3 + $0x41] sm:$0xff] %v787_v52  ;;  %v744_v58 = vadd.f32 %v743_v44, %v639_v53  ;;  %v1680_v59 = vadd.f32 %v1679_v55, %v1678_v51  ;;  %v1844_v60 = vpop.f32.mrf.mxu1  ;;  %v905_v61 = vpack.c.bf16 %v890_v57, %v889_v56  ;;  %v864_v62 = vld [vmem:[#allocation3 + $0x31] sm:$0xff] }
 0x118   : > { %822 = vst [vmem:[#allocation3 + $0x47] sm:$0x1] %v1976_v1  ;;  %823 = vst [vmem:[#allocation3 + $0x48] sm:$0x1] %v1976_v1  ;;  %v1681_v63 = vpop.f32.mrf.mxu0  ;;  %v879_v0 = vpack.c.bf16 %v786_v42, %v864_v62  ;;  %v837_v6 = vld [vmem:[#allocation3 + $0x30] sm:$0xff] }
 0x119   : > { %v788_v2 = vmax.f32 %v744_v58, 0.0  ;;  %v644_v3 = vadd.f32 %v1680_v59, %v2253_v18  ;;  %v751_v4 = vpop.f32.mrf.mxu1 }
 0x11a   : > { %v1682_v5 = vpop.f32.mrf.mxu0  ;;  %1883 = vmatmul.mubr.bf16.gmra.mxu1 %v905_v61  ;;  %1167 = vmatprep.mubr.bf16.mxu0 %v879_v0  ;;  %v838_v7 = vld [vmem:[#allocation3 + $0x38] sm:$0xff] }
 0x11b   : > { %806 = vst [vmem:[#allocation3 + $0x49] sm:$0xff] %v788_v2  ;;  %v2278_v8 = vadd.f32 %v748_v54, %v644_v3  ;;  %v1683_v9 = vadd.f32 %v1682_v5, %v1681_v63  ;;  %v1845_v10 = vpop.f32.mrf.mxu1  ;;  %v852_v11 = vpack.c.bf16 %v838_v7, %v837_v6  ;;  %1886 = vmatprep.mubr.msk.bf16.mxu1 %vm1977_vm0, %v1976_v1  ;;  %v891_v17 = vld [vmem:[#allocation3 + $0x32] sm:$0xff] }
 0x11c   : > { %v1684_v12 = vpop.f32.mrf.mxu0 }
 0x11d   : > { %v789_v13 = vmax.f32 %v2278_v8, 0.0  ;;  %v647_v14 = vadd.f32 %v1683_v9, %v2253_v18  ;;  %v756_v15 = vpop.f32.mrf.mxu1  ;;  %1168 = vmatmul.mubr.bf16.gmra.mxu0 %v852_v11 }
 0x11e   : > { %v1685_v16 = vpop.f32.mrf.mxu0  ;;  %v892_v19 = vld [vmem:[#allocation3 + $0x3a] sm:$0xff] }
 0x11f   : > { %807 = vst [vmem:[#allocation3 + $0x51] sm:$0xff] %v789_v13  ;;  %v752_v20 = vadd.f32 %v751_v4, %v647_v14  ;;  %v1686_v21 = vadd.f32 %v1685_v16, %v1684_v12  ;;  %v1848_v22 = vpop.f32.mrf.mxu1  ;;  %v906_v23 = vpack.c.bf16 %v892_v19, %v891_v17  ;;  %v866_v24 = vld [vmem:[#allocation3 + $0x41] sm:$0xff] }
 0x120   : > { %v1687_v25 = vpop.f32.mrf.mxu0  ;;  %v880_v26 = vpack.c.bf16 %v788_v2, %v866_v24  ;;  %v839_v31 = vld [vmem:[#allocation3 + $0x40] sm:$0xff] }
 0x121   : > { %v790_v27 = vmax.f32 %v752_v20, 0.0  ;;  %v652_v28 = vadd.f32 %v1686_v21, %v2253_v18  ;;  %v759_v29 = vpop.f32.mrf.mxu1 }
 0x122   : > { %v1688_v30 = vpop.f32.mrf.mxu0  ;;  %1887 = vmatmul.mubr.bf16.gmra.mxu1 %v906_v23  ;;  %1175 = vmatprep.mubr.bf16.mxu0 %v880_v26  ;;  %v840_v32 = vld [vmem:[#allocation3 + $0x48] sm:$0xff] }
 0x123   : > { %808 = vst [vmem:[#allocation3 + $0x59] sm:$0xff] %v790_v27  ;;  %v2285_v33 = vadd.f32 %v756_v15, %v652_v28  ;;  %v1689_v34 = vadd.f32 %v1688_v30, %v1687_v25  ;;  %v1849_v36 = vpop.f32.mrf.mxu1  ;;  %v853_v37 = vpack.c.bf16 %v840_v32, %v839_v31  ;;  %1890 = vmatprep.mubr.msk.bf16.mxu1 %vm1977_vm0, %v1976_v1  ;;  %v893_v43 = vld [vmem:[#allocation3 + $0x42] sm:$0xff] }
 0x124   : > { %824 = vst [vmem:[#allocation3 + $0x59] sm:$0x1] %v1976_v1  ;;  %825 = vst [vmem:[#allocation3 + $0x5a] sm:$0x1] %v1976_v1  ;;  %v1690_v38 = vpop.f32.mrf.mxu0 }
 0x125   : > { %v791_v39 = vmax.f32 %v2285_v33, 0.0  ;;  %v655_v40 = vadd.f32 %v1689_v34, %v2253_v18  ;;  %v764_v41 = vpop.f32.mrf.mxu1  ;;  %1176 = vmatmul.mubr.bf16.gmra.mxu0 %v853_v37 }
 0x126   : > { %v1691_v42 = vpop.f32.mrf.mxu0  ;;  %v894_v44 = vld [vmem:[#allocation3 + $0x4a] sm:$0xff] }
 0x127   : > { %809 = vst [vmem:[#allocation3 + $0x61] sm:$0xff] %v791_v39  ;;  %v760_v35 = vadd.f32 %v759_v29, %v655_v40  ;;  %v1692_v45 = vadd.f32 %v1691_v42, %v1690_v38  ;;  %v1852_v46 = vpop.f32.mrf.mxu1  ;;  %v907_v47 = vpack.c.bf16 %v894_v44, %v893_v43  ;;  %v841_v57 = vld [vmem:[#allocation3 + $0x50] sm:$0xff] }
 0x128   : > { %v1693_v48 = vpop.f32.mrf.mxu0 }
 0x129   : > { %v792_v49 = vmax.f32 %v760_v35, 0.0  ;;  %v660_v50 = vadd.f32 %v1692_v45, %v2253_v18  ;;  %v767_v51 = vpop.f32.mrf.mxu1 }
 0x12a   : > { %v1694_v52 = vpop.f32.mrf.mxu0  ;;  %1891 = vmatmul.mubr.bf16.gmra.mxu1 %v907_v47  ;;  %v2312_v47 = vld [vmem:[%s2390_s4] ss:$0 sm:$0xff] }
 0x12b   : > { %810 = vst [vmem:[#allocation3 + $0x69] sm:$0xff] %v792_v49  ;;  %v765_v53 = vadd.f32 %v764_v41, %v660_v50  ;;  %v1695_v54 = vadd.f32 %v1694_v52, %v1693_v48  ;;  %v1853_v55 = vpop.f32.mrf.mxu1  ;;  %v869_v56 = vld [vmem:[#allocation3 + $0x59] sm:$0xff]  ;;  %1894 = vmatprep.mubr.msk.bf16.mxu1 %vm1977_vm0, %v1976_v1 }
 0x12c   : > { %v842_v58 = vld [vmem:[#allocation3 + $0x58] sm:$0xff]  ;;  %826 = vst [vmem:[#allocation3 + $0x6b] sm:$0x1] %v1976_v1  ;;  %827 = vst [vmem:[#allocation3 + $0x6c] sm:$0x1] %v1976_v1  ;;  %v1696_v59 = vpop.f32.mrf.mxu0  ;;  %v881_v60 = vpack.c.bf16 %v869_v56, %v789_v13 }
 0x12d   : > { %v854_v61 = vpack.c.bf16 %v842_v58, %v841_v57  ;;  %v793_v62 = vmax.f32 %v765_v53, 0.0  ;;  %v663_v63 = vadd.f32 %v1695_v54, %v2253_v18  ;;  %v772_v0 = vpop.f32.mrf.mxu1  ;;  %v895_v3 = vld [vmem:[#allocation3 + $0x52] sm:$0xff] }
 0x12e   : > { %v1697_v2 = vpop.f32.mrf.mxu0  ;;  %1183 = vmatprep.mubr.bf16.mxu0 %v881_v60  ;;  %v896_v4 = vld [vmem:[#allocation3 + $0x5a] sm:$0xff] }
 0x12f   : > { %811 = vst [vmem:[#allocation3 + $0x71] sm:$0xff] %v793_v62  ;;  %v768_v5 = vadd.f32 %v767_v51, %v663_v63  ;;  %v1698_v6 = vadd.f32 %v1697_v2, %v1696_v59  ;;  %v1856_v7 = vpop.f32.mrf.mxu1  ;;  %1184 = vmatmul.mubr.bf16.gmra.mxu0 %v854_v61  ;;  %v908_v8 = vpack.c.bf16 %v896_v4, %v895_v3  ;;  %v843_v19 = vld [vmem:[#allocation3 + $0x60] sm:$0xff]  ;;  %v1321_v51 = vld [vmem:[%s2112_s16] sm:$0xff]  ;;  %v1322_v60 = vld [vmem:[%s2112_s16 + $0x8] sm:$0xff] }
 0x130   : > { %v1699_v9 = vpop.f32.mrf.mxu0  ;;  %v1595_v4 = vld [vmem:[%s2112_s16 + $0x18] sm:$0xff] }
 0x131   : > { %v794_v10 = vmax.f32 %v768_v5, 0.0  ;;  %v668_v11 = vadd.f32 %v1698_v6, %v2253_v18  ;;  %v775_v12 = vpop.f32.mrf.mxu1 }
 0x132   : > { %v1700_v13 = vpop.f32.mrf.mxu0  ;;  %1895 = vmatmul.mubr.bf16.gmra.mxu1 %v908_v8  ;;  %v897_v25 = vld [vmem:[#allocation3 + $0x62] sm:$0xff] }
 0x133   : > { %812 = vst [vmem:[#allocation3 + $0x79] sm:$0xff] %v794_v10  ;;  %v773_v14 = vadd.f32 %v772_v0, %v668_v11  ;;  %v1701_v15 = vadd.f32 %v1700_v13, %v1699_v9  ;;  %v1857_v16 = vpop.f32.mrf.mxu1  ;;  %v871_v17 = vld [vmem:[#allocation3 + $0x69] sm:$0xff]  ;;  %1898 = vmatprep.mubr.msk.bf16.mxu1 %vm1977_vm0, %v1976_v1  ;;  %v1335_v11 = vrot.slane %v1595_v4, 6 }
 0x134   : > { %v844_v20 = vld [vmem:[#allocation3 + $0x68] sm:$0xff]  ;;  %828 = vst [vmem:[#allocation3 + $0x7d] sm:$0x1] %v1976_v1  ;;  %829 = vst [vmem:[#allocation3 + $0x7e] sm:$0x1] %v1976_v1  ;;  %v882_v21 = vpack.c.bf16 %v871_v17, %v791_v39 }
 0x135   : > { %v855_v22 = vpack.c.bf16 %v844_v20, %v843_v19  ;;  %v795_v23 = vmax.f32 %v773_v14, 0.0  ;;  %v671_v24 = vadd.f32 %v1701_v15, %v2253_v18 }
 0x136   : > { %1191 = vmatprep.mubr.bf16.mxu0 %v882_v21  ;;  %v898_v26 = vld [vmem:[#allocation3 + $0x6a] sm:$0xff] }
 0x137   : > { %813 = vst [vmem:[#allocation3 + $0x81] sm:$0xff] %v795_v23  ;;  %v776_v27 = vadd.f32 %v775_v12, %v671_v24  ;;  %1192 = vmatmul.mubr.bf16.gmra.mxu0 %v855_v22  ;;  %v909_v28 = vpack.c.bf16 %v898_v26, %v897_v25  ;;  %v845_v31 = vld [vmem:[#allocation3 + $0x70] sm:$0xff] }
 0x139   : > { %v796_v29 = vmax.f32 %v776_v27, 0.0 }
 0x13a   : > { %1899 = vmatmul.mubr.bf16.gmra.mxu1 %v909_v28  ;;  %v899_v18 = vld [vmem:[#allocation3 + $0x72] sm:$0xff] }
 0x13b   : > { %814 = vst [vmem:[#allocation3 + $0x89] sm:$0x3f] %v796_v29  ;;  %v873_v30 = vld [vmem:[#allocation3 + $0x79] sm:$0xff]  ;;  %1902 = vmatprep.mubr.msk.bf16.mxu1 %vm1977_vm0, %v1976_v1 }
 0x13c   : > { %v846_v32 = vld [vmem:[#allocation3 + $0x78] sm:$0xff]  ;;  %v883_v33 = vpack.c.bf16 %v873_v30, %v793_v62  ;;  %v1594_v62 = vld [vmem:[%s2112_s16 + $0x10] sm:$0xff] }
 0x13d   : > { %v856_v34 = vpack.c.bf16 %v846_v32, %v845_v31  ;;  %v1334_v9 = vrot.slane %v1594_v62, 6  ;;  %v1600_v28 = vld [vmem:[%s2112_s16 + $0x28] sm:$0xff] }
 0x13e   : > { %1199 = vmatprep.mubr.bf16.mxu0 %v883_v33  ;;  %v900_v36 = vld [vmem:[#allocation3 + $0x7a] sm:$0xff] }
 0x13f   : > { %1200 = vmatmul.mubr.bf16.gmra.mxu0 %v856_v34  ;;  %v910_v37 = vpack.c.bf16 %v900_v36, %v899_v18  ;;  %v847_v41 = vld [vmem:[#allocation3 + $0x80] sm:$0xff]  ;;  %v1336_v21 = vsel %vm1333_vm1, %v1334_v9, %v1335_v11  ;;  %v1356_v18 = vrot.slane %v1600_v28, 4 }
 0x142   : > { %1903 = vmatmul.mubr.bf16.gmra.mxu1 %v910_v37  ;;  %v875_v38 = vld [vmem:[#allocation3 + $0x89] sm:$0x3f] }
 0x143   : > { %v848_v39 = vld [vmem:[#allocation3 + $0x88] sm:$0x3f]  ;;  %v884_v40 = vpack.c.bf16 %v875_v38, %v795_v23  ;;  %1906 = vmatprep.mubr.msk.bf16.mxu1 %vm1977_vm0, %v1976_v1  ;;  %v1599_v23 = vld [vmem:[%s2112_s16 + $0x20] sm:$0xff] }
 0x144   : > { %v857_v42 = vpack.c.bf16 %v848_v39, %v847_v41  ;;  %v901_v43 = vld [vmem:[#allocation3 + $0x82] sm:$0xff]  ;;  %v902_v44 = vld [vmem:[#allocation3 + $0x8a] sm:$0x3f]  ;;  %v1355_v33 = vrot.slane %v1599_v23, 4 }
 0x145   : > { %1207 = vmatprep.mubr.bf16.mxu0 %v884_v40  ;;  %v911_v35 = vpack.c.bf16 %v902_v44, %v901_v43 }
 0x147   : > { %1208 = vmatmul.mubr.bf16.gmra.mxu0 %v857_v42 }
 0x14a   : > { %1907 = vmatmul.mubr.bf16.gmra.mxu1 %v911_v35  ;;  %v1357_v35 = vsel %vm1354_vm2, %v1355_v33, %v1356_v18 }
 0x1c5   : > { %v1735_v45 = vpop.f32.mrf.mxu0 }
 0x1c7   : > { %v1736_v46 = vpop.f32.mrf.mxu0 }
 0x1c8   : > { %v1737_v48 = vadd.f32 %v1736_v46, %v1735_v45  ;;  %v1604_v46 = vld [vmem:[%s2112_s16 + $0x30] sm:$0xff] }
 0x1c9   : > { %v1738_v1 = vpop.f32.mrf.mxu0 }
 0x1ca   : > { %v1146_v49 = vadd.f32 %v1737_v48, %v2312_v47  ;;  %v1250_v50 = vpop.f32.mrf.mxu1 }
 0x1cb   : > { %v1739_v52 = vpop.f32.mrf.mxu0 }
 0x1cc   : > { %v1251_v53 = vadd.f32 %v1250_v50, %v1146_v49  ;;  %v1740_v54 = vadd.f32 %v1739_v52, %v1738_v1  ;;  %v1876_v55 = vpop.f32.mrf.mxu1  ;;  %v1605_v52 = vld [vmem:[%s2112_s16 + $0x38] sm:$0xff] }
 0x1cd   : > { %v1741_v56 = vpop.f32.mrf.mxu0 }
 0x1ce   : > { %v1323_v57 = vadd.f32 %v1321_v51, %v1251_v53  ;;  %v1149_v58 = vadd.f32 %v1740_v54, %v2312_v47  ;;  %v1253_v59 = vpop.f32.mrf.mxu1 }
 0x1cf   : > { %v1742_v61 = vpop.f32.mrf.mxu0 }
 0x1d0   : > { %v1325_v63 = vmax.f32 %v1323_v57, 0.0  ;;  %v1254_v0 = vadd.f32 %v1253_v59, %v1149_v58  ;;  %v1743_v2 = vadd.f32 %v1742_v61, %v1741_v56  ;;  %v1877_v3 = vpop.f32.mrf.mxu1  ;;  %v1376_v57 = vrot.slane %v1604_v46, 2 }
 0x1d1   : > { %v1744_v5 = vpop.f32.mrf.mxu0  ;;  %v1377_v59 = vrot.slane %v1605_v52, 2 }
 0x1d2   : > { %1327 = vst [vmem:[%s2322_s15] sm:$0xff] %v1325_v63  ;;  %v1324_v6 = vadd.f32 %v1322_v60, %v1254_v0  ;;  %v1154_v7 = vadd.f32 %v1743_v2, %v2312_v47  ;;  %v1258_v8 = vpop.f32.mrf.mxu1 }
 0x1d3   : > { %v1745_v10 = vpop.f32.mrf.mxu0 }
 0x1d4   : > { %v1326_v12 = vmax.f32 %v1324_v6, 0.0  ;;  %v1259_v13 = vadd.f32 %v1258_v8, %v1154_v7  ;;  %v1746_v14 = vadd.f32 %v1745_v10, %v1744_v5  ;;  %v1880_v15 = vpop.f32.mrf.mxu1  ;;  %v1378_v6 = vsel %vm1375_vm3, %v1376_v57, %v1377_v59 }
 0x1d5   : > { %v1747_v16 = vpop.f32.mrf.mxu0 }
 0x1d6   : > { %1328 = vst [vmem:[%s2322_s15 + $0x8] sm:$0xff] %v1326_v12  ;;  %v1340_v17 = vadd.f32 %v1334_v9, %v1259_v13  ;;  %v1157_v19 = vadd.f32 %v1746_v14, %v2312_v47  ;;  %v1261_v20 = vpop.f32.mrf.mxu1 }
 0x1d7   : > { %v1748_v22 = vpop.f32.mrf.mxu0 }
 0x1d8   : > { %v1343_v24 = vmax.f32 %v1340_v17, 0.0  ;;  %v1262_v25 = vadd.f32 %v1261_v20, %v1157_v19  ;;  %v1749_v26 = vadd.f32 %v1748_v22, %v1747_v16  ;;  %v1881_v27 = vpop.f32.mrf.mxu1 }
 0x1d9   : > { %v1750_v29 = vpop.f32.mrf.mxu0 }
 0x1da   : > { %1596 = vst [vmem:[%s2322_s15 + $0xe] sm:$0xfc] %v1343_v24  ;;  %v1341_v30 = vadd.f32 %v1336_v21, %v1262_v25  ;;  %v1162_v31 = vadd.f32 %v1749_v26, %v2312_v47  ;;  %v1266_v32 = vpop.f32.mrf.mxu1  ;;  %v1609_v26 = vld [vmem:[%s2112_s16 + $0x40] sm:$0xff] }
 0x1db   : > { %v1751_v34 = vpop.f32.mrf.mxu0 }
 0x1dc   : > { %v1344_v36 = vmax.f32 %v1341_v30, 0.0  ;;  %v1267_v37 = vadd.f32 %v1266_v32, %v1162_v31  ;;  %v1752_v38 = vadd.f32 %v1751_v34, %v1750_v29  ;;  %v1884_v39 = vpop.f32.mrf.mxu1 }
 0x1dd   : > { %v1753_v40 = vpop.f32.mrf.mxu0  ;;  %v1610_v39 = vld [vmem:[%s2112_s16 + $0x48] sm:$0xff] }
 0x1de   : > { %1597 = vst [vmem:[%s2322_s15 + $0x16] sm:$0xff] %v1344_v36  ;;  %v1342_v41 = vadd.f32 %v1335_v11, %v1267_v37  ;;  %v1361_v42 = vadd.f32 %v1355_v33, %v1267_v37  ;;  %v1165_v43 = vadd.f32 %v1752_v38, %v2312_v47  ;;  %v1269_v44 = vpop.f32.mrf.mxu1 }
 0x1df   : > { %v1754_v45 = vpop.f32.mrf.mxu0 }
 0x1e0   : > { %v1345_v48 = vmax.f32 %v1342_v41, 0.0  ;;  %v1364_v1 = vmax.f32 %v1361_v42, 0.0  ;;  %v1270_v49 = vadd.f32 %v1269_v44, %v1165_v43  ;;  %v1755_v50 = vadd.f32 %v1754_v45, %v1753_v40  ;;  %v1885_v51 = vpop.f32.mrf.mxu1  ;;  %v1613_v41 = vld [vmem:[%s2112_s16 + $0x50] sm:$0xff] }
 0x1e1   : > { %v1756_v53 = vpop.f32.mrf.mxu0 }
 0x1e2   : > { %1598 = vst [vmem:[%s2322_s15 + $0x1e] sm:$0x3] %v1345_v48  ;;  %1601 = vst [vmem:[%s2322_s15 + $0x1c] sm:$0xf0] %v1364_v1  ;;  %v1362_v54 = vadd.f32 %v1357_v35, %v1270_v49  ;;  %v1170_v55 = vadd.f32 %v1755_v50, %v2312_v47  ;;  %v1274_v56 = vpop.f32.mrf.mxu1  ;;  %v1614_v35 = vld [vmem:[%s2112_s16 + $0x58] sm:$0xff]  ;;  %v1405_v1 = vrot.slane %v1613_v41, 6 }
 0x1e3   : > { %v1757_v58 = vpop.f32.mrf.mxu0  ;;  %v1406_v51 = vrot.slane %v1614_v35, 6 }
 0x1e4   : > { %v1365_v60 = vmax.f32 %v1362_v54, 0.0  ;;  %v1275_v61 = vadd.f32 %v1274_v56, %v1170_v55  ;;  %v1758_v62 = vadd.f32 %v1757_v58, %v1756_v53  ;;  %v1888_v63 = vpop.f32.mrf.mxu1 }
 0x1e5   : > { %v1759_v0 = vpop.f32.mrf.mxu0 }
 0x1e6   : > { %1602 = vst [vmem:[%s2322_s15 + $0x24] sm:$0xff] %v1365_v60  ;;  %v1363_v2 = vadd.f32 %v1356_v18, %v1275_v61  ;;  %v1382_v3 = vadd.f32 %v1376_v57, %v1275_v61  ;;  %v1173_v4 = vadd.f32 %v1758_v62, %v2312_v47  ;;  %v1277_v5 = vpop.f32.mrf.mxu1  ;;  %v1407_v60 = vsel %vm1333_vm1, %v1405_v1, %v1406_v51  ;;  %v1618_v62 = vld [vmem:[%s2112_s16 + $0x60] sm:$0xff] }
 0x1e7   : > { %v1760_v7 = vpop.f32.mrf.mxu0 }
 0x1e8   : > { %v1366_v8 = vmax.f32 %v1363_v2, 0.0  ;;  %v1385_v9 = vmax.f32 %v1382_v3, 0.0  ;;  %v1278_v10 = vadd.f32 %v1277_v5, %v1173_v4  ;;  %v1761_v11 = vadd.f32 %v1760_v7, %v1759_v0  ;;  %v1889_v12 = vpop.f32.mrf.mxu1  ;;  %v1619_v4 = vld [vmem:[%s2112_s16 + $0x68] sm:$0xff] }
 0x1e9   : > { %v1762_v13 = vpop.f32.mrf.mxu0 }
 0x1ea   : > { %1603 = vst [vmem:[%s2322_s15 + $0x2c] sm:$0xf] %v1366_v8  ;;  %1606 = vst [vmem:[%s2322_s15 + $0x2a] sm:$0xc0] %v1385_v9  ;;  %v1383_v14 = vadd.f32 %v1378_v6, %v1278_v10  ;;  %v1178_v15 = vadd.f32 %v1761_v11, %v2312_v47  ;;  %v1282_v16 = vpop.f32.mrf.mxu1  ;;  %v1425_v8 = vrot.slane %v1618_v62, 4  ;;  %v1426_v11 = vrot.slane %v1619_v4, 4 }
 0x1eb   : > { %v1763_v17 = vpop.f32.mrf.mxu0 }
 0x1ec   : > { %v1386_v19 = vmax.f32 %v1383_v14, 0.0  ;;  %v1283_v20 = vadd.f32 %v1282_v16, %v1178_v15  ;;  %v1764_v21 = vadd.f32 %v1763_v17, %v1762_v13  ;;  %v1892_v22 = vpop.f32.mrf.mxu1 }
 0x1ed   : > { %v1427_v22 = vsel %vm1354_vm2, %v1425_v8, %v1426_v11 }
 0x1ee   : > { %1607 = vst [vmem:[%s2322_s15 + $0x32] sm:$0xff] %v1386_v19  ;;  %v1384_v23 = vadd.f32 %v1377_v59, %v1283_v20  ;;  %v1181_v24 = vadd.f32 %v1764_v21, %v2312_v47  ;;  %v1285_v25 = vpop.f32.mrf.mxu1 }
 0x1ef   : > { %v1765_v27 = vpop.f32.mrf.mxu0 }
 0x1f0   : > { %v1387_v28 = vmax.f32 %v1384_v23, 0.0  ;;  %v1286_v29 = vadd.f32 %v1285_v25, %v1181_v24  ;;  %v1893_v30 = vpop.f32.mrf.mxu1  ;;  %v1623_v24 = vld [vmem:[%s2112_s16 + $0x70] sm:$0xff] }
 0x1f1   : > { %v1766_v31 = vpop.f32.mrf.mxu0  ;;  %v1624_v30 = vld [vmem:[%s2112_s16 + $0x78] sm:$0xff] }
 0x1f2   : > { %1608 = vst [vmem:[%s2322_s15 + $0x3a] sm:$0x3f] %v1387_v28  ;;  %v1394_v32 = vadd.f32 %v1609_v26, %v1286_v29  ;;  %v1767_v33 = vadd.f32 %v1766_v31, %v1765_v27  ;;  %v1290_v34 = vpop.f32.mrf.mxu1 }
 0x1f3   : > { %v1768_v18 = vpop.f32.mrf.mxu0 }
 0x1f4   : > { %v1396_v36 = vmax.f32 %v1394_v32, 0.0  ;;  %v1186_v37 = vadd.f32 %v1767_v33, %v2312_v47  ;;  %v1896_v38 = vpop.f32.mrf.mxu1 }
 0x1f5   : > { %v1769_v40 = vpop.f32.mrf.mxu0 }
 0x1f6   : > { %1611 = vst [vmem:[%s2322_s15 + $0x40] sm:$0xff] %v1396_v36  ;;  %v1291_v42 = vadd.f32 %v1290_v34, %v1186_v37  ;;  %v1770_v43 = vadd.f32 %v1769_v40, %v1768_v18  ;;  %v1293_v44 = vpop.f32.mrf.mxu1  ;;  %v1445_v34 = vrot.slane %v1623_v24, 2  ;;  %v1446_v37 = vrot.slane %v1624_v30, 2 }
 0x1f7   : > { %v1771_v45 = vpop.f32.mrf.mxu0 }
 0x1f8   : > { %v1395_v46 = vadd.f32 %v1610_v39, %v1291_v42  ;;  %v1189_v48 = vadd.f32 %v1770_v43, %v2312_v47  ;;  %v1897_v49 = vpop.f32.mrf.mxu1 }
 0x1f9   : > { %v1772_v50 = vpop.f32.mrf.mxu0 }
 0x1fa   : > { %v1397_v52 = vmax.f32 %v1395_v46, 0.0  ;;  %v1294_v53 = vadd.f32 %v1293_v44, %v1189_v48  ;;  %v1773_v54 = vadd.f32 %v1772_v50, %v1771_v45  ;;  %v1298_v55 = vpop.f32.mrf.mxu1  ;;  %v1447_v46 = vsel %vm1375_vm3, %v1445_v34, %v1446_v37 }
 0x1fb   : > { %v1774_v56 = vpop.f32.mrf.mxu0 }
 0x1fc   : > { %1612 = vst [vmem:[%s2322_s15 + $0x48] sm:$0xff] %v1397_v52  ;;  %v1411_v57 = vadd.f32 %v1405_v1, %v1294_v53  ;;  %v1194_v58 = vadd.f32 %v1773_v54, %v2312_v47  ;;  %v1900_v59 = vpop.f32.mrf.mxu1 }
 0x1fd   : > { %v1775_v61 = vpop.f32.mrf.mxu0 }
 0x1fe   : > { %v1414_v63 = vmax.f32 %v1411_v57, 0.0  ;;  %v1299_v0 = vadd.f32 %v1298_v55, %v1194_v58  ;;  %v1776_v2 = vadd.f32 %v1775_v61, %v1774_v56  ;;  %v1301_v3 = vpop.f32.mrf.mxu1 }
 0x1ff   : > { %v1777_v5 = vpop.f32.mrf.mxu0 }
 0x200   : > { %1615 = vst [vmem:[%s2322_s15 + $0x4e] sm:$0xfc] %v1414_v63  ;;  %v1412_v6 = vadd.f32 %v1407_v60, %v1299_v0  ;;  %v1197_v7 = vadd.f32 %v1776_v2, %v2312_v47  ;;  %v1901_v9 = vpop.f32.mrf.mxu1 }
 0x201   : > { %v1778_v10 = vpop.f32.mrf.mxu0 }
 0x202   : > { %v1415_v12 = vmax.f32 %v1412_v6, 0.0  ;;  %v1302_v13 = vadd.f32 %v1301_v3, %v1197_v7  ;;  %v1779_v14 = vadd.f32 %v1778_v10, %v1777_v5  ;;  %v1306_v15 = vpop.f32.mrf.mxu1 }
 0x203   : > { %v1780_v16 = vpop.f32.mrf.mxu0 }
 0x204   : > { %1616 = vst [vmem:[%s2322_s15 + $0x56] sm:$0xff] %v1415_v12  ;;  %v1413_v17 = vadd.f32 %v1406_v51, %v1302_v13  ;;  %v1431_v19 = vadd.f32 %v1425_v8, %v1302_v13  ;;  %v1202_v20 = vadd.f32 %v1779_v14, %v2312_v47  ;;  %v1904_v21 = vpop.f32.mrf.mxu1 }
 0x205   : > { %v1781_v23 = vpop.f32.mrf.mxu0 }
 0x206   : > { %v1416_v25 = vmax.f32 %v1413_v17, 0.0  ;;  %v1434_v26 = vmax.f32 %v1431_v19, 0.0  ;;  %v1307_v27 = vadd.f32 %v1306_v15, %v1202_v20  ;;  %v1782_v28 = vadd.f32 %v1781_v23, %v1780_v16  ;;  %v1309_v29 = vpop.f32.mrf.mxu1 }
 0x207   : > { %v1783_v31 = vpop.f32.mrf.mxu0 }
 0x208   : > { %1617 = vst [vmem:[%s2322_s15 + $0x5e] sm:$0x3] %v1416_v25  ;;  %1620 = vst [vmem:[%s2322_s15 + $0x5c] sm:$0xf0] %v1434_v26  ;;  %v1432_v32 = vadd.f32 %v1427_v22, %v1307_v27  ;;  %v1205_v33 = vadd.f32 %v1782_v28, %v2312_v47  ;;  %v1905_v18 = vpop.f32.mrf.mxu1 }
 0x209   : > { %v1784_v36 = vpop.f32.mrf.mxu0 }
 0x20a   : > { %v1435_v38 = vmax.f32 %v1432_v32, 0.0  ;;  %v1310_v39 = vadd.f32 %v1309_v29, %v1205_v33  ;;  %v1785_v40 = vadd.f32 %v1784_v36, %v1783_v31  ;;  %v1314_v41 = vpop.f32.mrf.mxu1 }
 0x20b   : > { %v1786_v42 = vpop.f32.mrf.mxu0 }
 0x20c   : > { %1621 = vst [vmem:[%s2322_s15 + $0x64] sm:$0xff] %v1435_v38  ;;  %v1433_v43 = vadd.f32 %v1426_v11, %v1310_v39  ;;  %v1451_v44 = vadd.f32 %v1445_v34, %v1310_v39  ;;  %v1210_v35 = vadd.f32 %v1785_v40, %v2312_v47  ;;  %v1908_v45 = vpop.f32.mrf.mxu1 }
 0x20d   : > { %v1787_v48 = vpop.f32.mrf.mxu0 }
 0x20e   : > { %v1436_v1 = vmax.f32 %v1433_v43, 0.0  ;;  %v1454_v49 = vmax.f32 %v1451_v44, 0.0  ;;  %v1315_v50 = vadd.f32 %v1314_v41, %v1210_v35  ;;  %v1788_v51 = vadd.f32 %v1787_v48, %v1786_v42  ;;  %v1317_v52 = vpop.f32.mrf.mxu1 }
 0x210   : > { %1622 = vst [vmem:[%s2322_s15 + $0x6c] sm:$0xf] %v1436_v1  ;;  %1625 = vst [vmem:[%s2322_s15 + $0x6a] sm:$0xc0] %v1454_v49  ;;  %v1452_v53 = vadd.f32 %v1447_v46, %v1315_v50  ;;  %v1213_v54 = vadd.f32 %v1788_v51, %v2312_v47  ;;  %v1909_v55 = vpop.f32.mrf.mxu1 }
 0x212   : > { %v1455_v56 = vmax.f32 %v1452_v53, 0.0  ;;  %v1318_v57 = vadd.f32 %v1317_v52, %v1213_v54 }
 0x214   : > { %1626 = vst [vmem:[%s2322_s15 + $0x72] sm:$0xff] %v1455_v56  ;;  %v1453_v58 = vadd.f32 %v1446_v37, %v1318_v57 }
 0x216   : > { %v1456_v59 = vmax.f32 %v1453_v58, 0.0 }
 0x218   : > { %1627 = vst [vmem:[%s2322_s15 + $0x7a] sm:$0x3f] %v1456_v59 }
 0x219 PF: > { %s15_s18 = sadd.s32 1, %s1974_s18  }
 0x21a   : > { %p12_p4 = scmp.ge.s32.totalorder %s15_s18, 6  }
 0x21c   :  { %14 = sbr.rel (!%p12_p4) target bundleno = 1 (0x1), region = 84 }

</bundles_post_ra>
